<compile_context>
chip_gen: v6e
topology: v6e:2x2x1
jax: 0.10.0
libtpu: 0.0.40
codegen_flags: <defaults>
</compile_context>

<pallas_src>
import math
import functools

import jax
import jax.numpy as jnp
from jax.experimental import pallas as pl
from jax.experimental.pallas import tpu as pltpu

_MXU_DTYPE = jnp.bfloat16           # matmul operand dtype (accumulation stays f32)
_VMEM_LIMIT = 32 * 1024 * 1024      # explicit scoped-VMEM budget; safe on v5e/v6e/v7x


def _pick_tile(dim, desired, multiple):
    """Largest tile <= desired that divides `dim` and is a multiple of `multiple`;
    falls back to the full dim (a full-extent block is always legal)."""
    if dim <= desired:
        return dim
    t = (desired // multiple) * multiple
    while t >= multiple:
        if dim % t == 0:
            return t
        t -= multiple
    return dim


# ----------------------------------------------------------------------------
# Pallas kernels
# ----------------------------------------------------------------------------

def _dense_kernel(*refs, activation, has_bias, has_residual):
    """out = act(x @ w [+ b]) [+ residual]   (bf16 MXU operands, f32 accum)."""
    x_ref, w_ref = refs[0], refs[1]
    i = 2
    b_ref = None
    r_ref = None
    if has_bias:
        b_ref = refs[i]; i += 1
    if has_residual:
        r_ref = refs[i]; i += 1
    o_ref = refs[i]

    x = x_ref[...].astype(_MXU_DTYPE)
    w = w_ref[...].astype(_MXU_DTYPE)
    y = jnp.dot(x, w, preferred_element_type=jnp.float32)
    if has_bias:
        y = y + b_ref[...].astype(jnp.float32)
    if activation == "gelu":
        # exact (erf-based) GELU, matching torch.nn.GELU() default
        y = 0.5 * y * (1.0 + jax.lax.erf(y * (1.0 / math.sqrt(2.0))))
    if has_residual:
        y = y + r_ref[...].astype(jnp.float32)
    o_ref[...] = y.astype(o_ref.dtype)


def _layernorm_kernel(x_ref, g_ref, b_ref, o_ref):
    """LayerNorm over the last dim, eps = 1e-5 (torch default), f32 math."""
    x = x_ref[...].astype(jnp.float32)
    mean = jnp.mean(x, axis=-1, keepdims=True)
    var = jnp.mean((x - mean) ** 2, axis=-1, keepdims=True)
    y = (x - mean) * jax.lax.rsqrt(var + 1e-5)
    o_ref[...] = (y * g_ref[...].astype(jnp.float32)
                  + b_ref[...].astype(jnp.float32)).astype(o_ref.dtype)


def _flash_attn_kernel(q_ref, k_ref, v_ref, o_ref, m_sc, l_sc, acc_sc,
                       *, causal, sm_scale, tq, tk):
    """Online-softmax attention for one (batch*head, q-tile); KV axis is the
    trailing 'arbitrary' grid axis with m/l/acc resident in VMEM scratch."""
    ki = pl.program_id(2)

    @pl.when(ki == 0)
    def _():
        m_sc[...] = jnp.full(m_sc.shape, -jnp.inf, m_sc.dtype)
        l_sc[...] = jnp.zeros(l_sc.shape, l_sc.dtype)
        acc_sc[...] = jnp.zeros(acc_sc.shape, acc_sc.dtype)

    q = q_ref[0].astype(_MXU_DTYPE)                       # (tq, hd)
    k = k_ref[0].astype(_MXU_DTYPE)                       # (tk, hd)
    # q k^T without an explicit transpose: contract the last dims directly.
    s = jax.lax.dot_general(q, k, (((1,), (1,)), ((), ())),
                            preferred_element_type=jnp.float32)
    s = s * sm_scale                                      # (tq, tk), f32

    if causal:
        qi = pl.program_id(1)
        row = qi * tq + jax.lax.broadcasted_iota(jnp.int32, (tq, tk), 0)
        col = ki * tk + jax.lax.broadcasted_iota(jnp.int32, (tq, tk), 1)
        s = jnp.where(row >= col, s, -1e30)               # finite fill: no NaN rows

    m_prev = m_sc[...]                                    # (tq, 1)
    m_new = jnp.maximum(m_prev, jnp.max(s, axis=-1, keepdims=True))
    alpha = jnp.exp(m_prev - m_new)
    p = jnp.exp(s - m_new)                                # (tq, tk), f32
    l_sc[...] = alpha * l_sc[...] + jnp.sum(p, axis=-1, keepdims=True)
    pv = jax.lax.dot_general(p.astype(_MXU_DTYPE), v_ref[0].astype(_MXU_DTYPE),
                             (((1,), (0,)), ((), ())),
                             preferred_element_type=jnp.float32)
    acc_sc[...] = alpha * acc_sc[...] + pv
    m_sc[...] = m_new

    @pl.when(ki == pl.num_programs(2) - 1)
    def _():
        inv_l = pl.reciprocal(l_sc[...], approx=True)
        o_ref[0] = (acc_sc[...] * inv_l).astype(o_ref.dtype)


# ----------------------------------------------------------------------------
# Pallas wrappers
# ----------------------------------------------------------------------------

def pallas_dense(x2d, w, b=None, residual=None, activation=None):
    N, Din = x2d.shape
    Dout = w.shape[1]
    tm = _pick_tile(N, 256, 8)          # row tile
    tn = _pick_tile(Dout, 512, 128)     # lane-dense output tile
    grid = (N // tm, Dout // tn)

    in_specs = [
        pl.BlockSpec((tm, Din), lambda i, j: (i, 0)),
        pl.BlockSpec((Din, tn), lambda i, j: (0, j)),
    ]
    args = [x2d, w]
    if b is not None:
        in_specs.append(pl.BlockSpec((1, tn), lambda i, j: (0, j)))
        args.append(b.reshape(1, Dout))
    if residual is not None:
        in_specs.append(pl.BlockSpec((tm, tn), lambda i, j: (i, j)))
        args.append(residual)

    kernel = functools.partial(_dense_kernel, activation=activation,
                               has_bias=b is not None,
                               has_residual=residual is not None)
    return pl.pallas_call(
        kernel,
        out_shape=jax.ShapeDtypeStruct((N, Dout), x2d.dtype),
        grid=grid,
        in_specs=in_specs,
        out_specs=pl.BlockSpec((tm, tn), lambda i, j: (i, j)),
        compiler_params=pltpu.CompilerParams(
            dimension_semantics=("parallel", "parallel"),
            vmem_limit_bytes=_VMEM_LIMIT),
    )(*args)


def pallas_layernorm(x2d, gamma, beta):
    N, D = x2d.shape
    tm = _pick_tile(N, 512, 8)
    return pl.pallas_call(
        _layernorm_kernel,
        out_shape=jax.ShapeDtypeStruct((N, D), x2d.dtype),
        grid=(N // tm,),
        in_specs=[
            pl.BlockSpec((tm, D), lambda i: (i, 0)),
            pl.BlockSpec((1, D), lambda i: (0, 0)),
            pl.BlockSpec((1, D), lambda i: (0, 0)),
        ],
        out_specs=pl.BlockSpec((tm, D), lambda i: (i, 0)),
        compiler_params=pltpu.CompilerParams(
            dimension_semantics=("parallel",),
            vmem_limit_bytes=_VMEM_LIMIT),
    )(x2d, gamma.reshape(1, D), beta.reshape(1, D))


def pallas_attention(q, k, v, *, causal):
    """q: (B*H, Sq, hd); k, v: (B*H, Skv, hd)  ->  (B*H, Sq, hd)."""
    BH, Sq, hd = q.shape
    Skv = k.shape[1]
    tq = _pick_tile(Sq, 128, 8)
    tk = _pick_tile(Skv, 128, 8)
    grid = (BH, Sq // tq, Skv // tk)
    kernel = functools.partial(_flash_attn_kernel, causal=causal,
                               sm_scale=1.0 / math.sqrt(hd), tq=tq, tk=tk)
    return pl.pallas_call(
        kernel,
        out_shape=jax.ShapeDtypeStruct((BH, Sq, hd), q.dtype),
        grid=grid,
        in_specs=[
            pl.BlockSpec((1, tq, hd), lambda b, qi, ki: (b, qi, 0)),
            pl.BlockSpec((1, tk, hd), lambda b, qi, ki: (b, ki, 0)),
            pl.BlockSpec((1, tk, hd), lambda b, qi, ki: (b, ki, 0)),
        ],
        out_specs=pl.BlockSpec((1, tq, hd), lambda b, qi, ki: (b, qi, 0)),
        scratch_shapes=[
            pltpu.VMEM((tq, 1), jnp.float32),    # running max m
            pltpu.VMEM((tq, 1), jnp.float32),    # running denom l
            pltpu.VMEM((tq, hd), jnp.float32),   # output accumulator
        ],
        compiler_params=pltpu.CompilerParams(
            dimension_semantics=("parallel", "parallel", "arbitrary"),
            vmem_limit_bytes=_VMEM_LIMIT),
    )(q, k, v)


# ----------------------------------------------------------------------------
# Model pieces (glue in plain JAX, compute in Pallas)
# ----------------------------------------------------------------------------

def multi_head_attention(x_q, x_kv, p, n_heads, causal, residual=None):
    """Fused [wq|wk|wv] (D, 3D) projection, flash attention, wo (+ fused residual)."""
    B, Sq, D = x_q.shape
    Skv = x_kv.shape[1]
    hd = D // n_heads

    if x_q is x_kv:                                    # self-attention: one matmul
        qkv = pallas_dense(x_q.reshape(B * Sq, D), p["wqkv"])       # (B*Sq, 3D)
        q, k, v = qkv[:, :D], qkv[:, D:2 * D], qkv[:, 2 * D:]
    else:                                              # cross-attention: q | fused kv
        q = pallas_dense(x_q.reshape(B * Sq, D), p["wqkv"][:, :D])
        kv = pallas_dense(x_kv.reshape(B * Skv, D), p["wqkv"][:, D:])
        k, v = kv[:, :D], kv[:, D:]

    def to_heads(t, S):
        return t.reshape(B, S, n_heads, hd).transpose(0, 2, 1, 3).reshape(B * n_heads, S, hd)

    attn = pallas_attention(to_heads(q, Sq), to_heads(k, Skv), to_heads(v, Skv),
                            causal=causal)
    attn = attn.reshape(B, n_heads, Sq, hd).transpose(0, 2, 1, 3).reshape(B * Sq, D)

    out = pallas_dense(attn, p["wo"], p["bo"],
                       residual=None if residual is None else residual.reshape(B * Sq, D))
    return out.reshape(B, Sq, D)


def feed_forward(x, p, residual=None):
    B, S, D = x.shape
    h = pallas_dense(x.reshape(B * S, D), p["w1"], p["b1"], activation="gelu")
    o = pallas_dense(h, p["w2"], p["b2"],
                     residual=None if residual is None else residual.reshape(B * S, D))
    return o.reshape(B, S, D)


def layer_norm(x, p):
    B, S, D = x.shape
    return pallas_layernorm(x.reshape(B * S, D), p["g"], p["b"]).reshape(B, S, D)


def encoder_layer(x, p, n_heads):
    # norm1(x + attn(x)) ; norm2(ff(.) + .)   — residual adds fused into dense epilogues
    s1 = multi_head_attention(x, x, p["mha"], n_heads, causal=False, residual=x)
    norm_attn = layer_norm(s1, p["norm1"])
    s2 = feed_forward(norm_attn, p["ff"], residual=norm_attn)
    return layer_norm(s2, p["norm2"])


def decoder_layer(encoder_output, x, p, n_heads):
    norm_x = layer_norm(x, p["ln1"])
    x = multi_head_attention(norm_x, norm_x, p["self_mha"], n_heads,
                             causal=True, residual=x)
    x = multi_head_attention(layer_norm(x, p["ln2"]), encoder_output, p["cross_mha"],
                             n_heads, causal=False, residual=x)
    return feed_forward(layer_norm(x, p["ln3"]), p["ff"], residual=x)


def positional_embedding(seq_len, d_model):
    positions = jnp.arange(seq_len, dtype=jnp.float32)[:, None]
    div_term = jnp.exp(-jnp.arange(0, d_model, 2, dtype=jnp.float32)
                       * math.log(10000.0) / d_model)
    pe = jnp.zeros((seq_len, d_model), jnp.float32)
    pe = pe.at[:, 0::2].set(jnp.sin(positions * div_term))
    pe = pe.at[:, 1::2].set(jnp.cos(positions * div_term))
    return pe


def transformer_forward(params, src, trg, cfg):
    B, S = src.shape
    D = cfg["d_model"]
    pe = positional_embedding(cfg["sequence_length"], D)[:S]

    src_emb = params["enc_emb"][src] + pe               # (B, S, D)
    trg_emb = params["dec_emb"][trg] + pe

    enc_out = src_emb
    for p in params["encoder"]:
        enc_out = encoder_layer(enc_out, p, cfg["n_heads"])

    dec_out = trg_emb
    for p in params["decoder"]:
        dec_out = decoder_layer(enc_out, dec_out, p, cfg["n_heads"])
    return dec_out


# ----------------------------------------------------------------------------
# Deterministic parameter init (normal std=0.02 for linears/embeddings, zero
# biases, unit gamma / zero beta for LayerNorm) — mirrors _init_weights.
# ----------------------------------------------------------------------------

def _normal(key, shape, std=0.02):
    return std * jax.random.normal(key, shape, jnp.float32)


def init_params(key, cfg):
    D, Dff, V = cfg["d_model"], cfg["d_ff"], cfg["vocab_size"]

    def mha_params(k):
        k = jax.random.split(k, 2)
        return {
            "wqkv": _normal(k[0], (D, 3 * D)),   # [wq | wk | wv], no bias
            "wo": _normal(k[1], (D, D)),
            "bo": jnp.zeros((D,), jnp.float32),
        }

    def ff_params(k):
        k = jax.random.split(k, 2)
        return {
            "w1": _normal(k[0], (D, Dff)), "b1": jnp.zeros((Dff,), jnp.float32),
            "w2": _normal(k[1], (Dff, D)), "b2": jnp.zeros((D,), jnp.float32),
        }

    def ln_params():
        return {"g": jnp.ones((D,), jnp.float32), "b": jnp.zeros((D,), jnp.float32)}

    keys = jax.random.split(key, 2 + cfg["n_encoder_layers"] + cfg["n_decoder_layers"])
    params = {
        "enc_emb": _normal(keys[0], (V, D)),
        "dec_emb": _normal(keys[1], (V, D)),
        "encoder": [],
        "decoder": [],
    }
    idx = 2
    for _ in range(cfg["n_encoder_layers"]):
        k = jax.random.split(keys[idx], 2); idx += 1
        params["encoder"].append({
            "mha": mha_params(k[0]), "ff": ff_params(k[1]),
            "norm1": ln_params(), "norm2": ln_params(),
        })
    for _ in range(cfg["n_decoder_layers"]):
        k = jax.random.split(keys[idx], 3); idx += 1
        params["decoder"].append({
            "self_mha": mha_params(k[0]), "cross_mha": mha_params(k[1]),
            "ff": ff_params(k[2]),
            "ln1": ln_params(), "ln2": ln_params(), "ln3": ln_params(),
        })
    return params


# ----------------------------------------------------------------------------

if __name__ == "__main__":
    cfg = {
        "n_encoder_layers": 2,
        "n_decoder_layers": 2,
        "n_heads": 4,
        "d_model": 32,
        "sequence_length": 8,
        "vocab_size": 100,
        "d_ff": 64,
    }
    B, S = 2, cfg["sequence_length"]

    key = jax.random.PRNGKey(0)
    k_params, k_src, k_trg = jax.random.split(key, 3)
    params = init_params(k_params, cfg)

    src = jax.random.randint(k_src, (B, S), 0, cfg["vocab_size"], dtype=jnp.int32)
    trg = jax.random.randint(k_trg, (B, S), 0, cfg["vocab_size"], dtype=jnp.int32)

    fwd = jax.jit(functools.partial(transformer_forward, cfg=cfg))
    out = jax.block_until_ready(fwd(params, src, trg))

    assert out.shape == (B, S, cfg["d_model"])
    assert bool(jnp.all(jnp.isfinite(out)))
    print("KERNEL_OK")
</pallas_src>

<mosaic_0001>
module attributes {stable_mosaic.version = 11 : i64} {
  func.func @_layernorm_kernel(%arg0: i32, %arg1: memref<16x32xf32, #tpu.memory_space<vmem>>, %arg2: memref<1x32xf32, #tpu.memory_space<vmem>>, %arg3: memref<1x32xf32, #tpu.memory_space<vmem>>, %arg4: memref<16x32xf32, #tpu.memory_space<vmem>>) attributes {dimension_semantics = [#tpu.dimension_semantics<parallel>], iteration_bounds = array<i64: 1>, scalar_prefetch = 0 : i64, scratch_operands = 0 : i64, tpu.core_type = #tpu.core_type<tc>, window_params = [{transform_indices = @transform_0, window_bounds = array<i64: 16, 32>}, {pipeline_mode = #tpu.pipeline_mode<synchronous>, transform_indices = @transform_1, window_bounds = array<i64: 1, 32>}, {pipeline_mode = #tpu.pipeline_mode<synchronous>, transform_indices = @transform_2, window_bounds = array<i64: 1, 32>}, {transform_indices = @transform_3, window_bounds = array<i64: 16, 32>}]} {
    %c0 = arith.constant 0 : index
    %c0_0 = arith.constant 0 : index
    %0 = vector.load %arg1[%c0, %c0_0] : memref<16x32xf32, #tpu.memory_space<vmem>>, vector<16x32xf32>
    %cst = arith.constant dense<0.000000e+00> : vector<16xf32>
    %1 = vector.multi_reduction <add>, %0, %cst [1] : vector<16x32xf32> to vector<16xf32>
    %2 = vector.shape_cast %1 : vector<16xf32> to vector<16x1xf32>
    %cst_1 = arith.constant 3.200000e+01 : f32
    %3 = vector.broadcast %cst_1 : f32 to vector<16x1xf32>
    %4 = arith.divf %2, %3 : vector<16x1xf32>
    %5 = vector.broadcast %4 : vector<16x1xf32> to vector<16x32xf32>
    %6 = arith.subf %0, %5 : vector<16x32xf32>
    %7 = arith.mulf %6, %6 : vector<16x32xf32>
    %cst_2 = arith.constant dense<0.000000e+00> : vector<16xf32>
    %8 = vector.multi_reduction <add>, %7, %cst_2 [1] : vector<16x32xf32> to vector<16xf32>
    %9 = vector.shape_cast %8 : vector<16xf32> to vector<16x1xf32>
    %cst_3 = arith.constant 3.200000e+01 : f32
    %10 = vector.broadcast %cst_3 : f32 to vector<16x1xf32>
    %11 = arith.divf %9, %10 : vector<16x1xf32>
    %12 = vector.broadcast %4 : vector<16x1xf32> to vector<16x32xf32>
    %13 = arith.subf %0, %12 : vector<16x32xf32>
    %cst_4 = arith.constant 9.99999974E-6 : f32
    %14 = vector.broadcast %cst_4 : f32 to vector<16x1xf32>
    %15 = arith.addf %11, %14 : vector<16x1xf32>
    %16 = math.rsqrt %15 : vector<16x1xf32>
    %17 = vector.broadcast %16 : vector<16x1xf32> to vector<16x32xf32>
    %18 = arith.mulf %13, %17 : vector<16x32xf32>
    %c0_5 = arith.constant 0 : index
    %c0_6 = arith.constant 0 : index
    %19 = vector.load %arg2[%c0_5, %c0_6] : memref<1x32xf32, #tpu.memory_space<vmem>>, vector<1x32xf32>
    %20 = vector.broadcast %19 : vector<1x32xf32> to vector<16x32xf32>
    %21 = arith.mulf %18, %20 : vector<16x32xf32>
    %c0_7 = arith.constant 0 : index
    %c0_8 = arith.constant 0 : index
    %22 = vector.load %arg3[%c0_7, %c0_8] : memref<1x32xf32, #tpu.memory_space<vmem>>, vector<1x32xf32>
    %23 = vector.broadcast %22 : vector<1x32xf32> to vector<16x32xf32>
    %24 = arith.addf %21, %23 : vector<16x32xf32>
    %c0_9 = arith.constant 0 : index
    %c0_10 = arith.constant 0 : index
    %25 = vector.load %arg4[%c0_9, %c0_10] : memref<16x32xf32, #tpu.memory_space<vmem>>, vector<16x32xf32>
    tpu.vector_store %arg4[%c0_9, %c0_10], %24 {strides = array<i32>} : memref<16x32xf32, #tpu.memory_space<vmem>>, vector<16x32xf32>,
    return
  }
  func.func @transform_0(%arg0: i32) -> (i32, i32) {
    %c0_i32 = arith.constant 0 : i32
    %c0_i32_0 = arith.constant 0 : i32
    return %arg0, %c0_i32 : i32, i32
  }
  func.func @transform_1(%arg0: i32) -> (i32, i32) {
    %c0_i32 = arith.constant 0 : i32
    %c0_i32_0 = arith.constant 0 : i32
    %c0_i32_1 = arith.constant 0 : i32
    return %c0_i32, %c0_i32_0 : i32, i32
  }
  func.func @transform_2(%arg0: i32) -> (i32, i32) {
    %c0_i32 = arith.constant 0 : i32
    %c0_i32_0 = arith.constant 0 : i32
    %c0_i32_1 = arith.constant 0 : i32
    return %c0_i32, %c0_i32_0 : i32, i32
  }
  func.func @transform_3(%arg0: i32) -> (i32, i32) {
    %c0_i32 = arith.constant 0 : i32
    %c0_i32_0 = arith.constant 0 : i32
    return %arg0, %c0_i32 : i32, i32
  }
}

module attributes {stable_mosaic.version = 11 : i64} {
  func.func @_dense_kernel(%arg0: i32, %arg1: i32, %arg2: memref<16x32xf32, #tpu.memory_space<vmem>>, %arg3: memref<32x96xf32, #tpu.memory_space<vmem>>, %arg4: memref<16x96xf32, #tpu.memory_space<vmem>>) attributes {dimension_semantics = [#tpu.dimension_semantics<parallel>, #tpu.dimension_semantics<parallel>], iteration_bounds = array<i64: 1, 1>, scalar_prefetch = 0 : i64, scratch_operands = 0 : i64, tpu.core_type = #tpu.core_type<tc>, window_params = [{transform_indices = @transform_0, window_bounds = array<i64: 16, 32>}, {transform_indices = @transform_1, window_bounds = array<i64: 32, 96>}, {transform_indices = @transform_2, window_bounds = array<i64: 16, 96>}]} {
    %c0 = arith.constant 0 : index
    %c0_0 = arith.constant 0 : index
    %0 = vector.load %arg2[%c0, %c0_0] : memref<16x32xf32, #tpu.memory_space<vmem>>, vector<16x32xf32>
    %1 = arith.truncf %0 : vector<16x32xf32> to vector<16x32xbf16>
    %c0_1 = arith.constant 0 : index
    %c0_2 = arith.constant 0 : index
    %2 = vector.load %arg3[%c0_1, %c0_2] : memref<32x96xf32, #tpu.memory_space<vmem>>, vector<32x96xf32>
    %3 = arith.truncf %2 : vector<32x96xf32> to vector<32x96xbf16>
    %cst = arith.constant dense<0.000000e+00> : vector<16x96xf32>
    %4 = tpu.matmul %1, %3, %cst {dimension_numbers = #tpu.dot_dimension_numbers<[1], [0], [0], [1], [0, 0, 1, 1], [], []>} : vector<16x32xbf16>, vector<32x96xbf16>, vector<16x96xf32> -> vector<16x96xf32>
    %c0_3 = arith.constant 0 : index
    %c0_4 = arith.constant 0 : index
    %5 = vector.load %arg4[%c0_3, %c0_4] : memref<16x96xf32, #tpu.memory_space<vmem>>, vector<16x96xf32>
    tpu.vector_store %arg4[%c0_3, %c0_4], %4 {strides = array<i32>} : memref<16x96xf32, #tpu.memory_space<vmem>>, vector<16x96xf32>,
    return
  }
  func.func @transform_0(%arg0: i32, %arg1: i32) -> (i32, i32) {
    %c0_i32 = arith.constant 0 : i32
    %c0_i32_0 = arith.constant 0 : i32
    return %arg0, %c0_i32 : i32, i32
  }
  func.func @transform_1(%arg0: i32, %arg1: i32) -> (i32, i32) {
    %c0_i32 = arith.constant 0 : i32
    %c0_i32_0 = arith.constant 0 : i32
    return %c0_i32, %arg1 : i32, i32
  }
  func.func @transform_2(%arg0: i32, %arg1: i32) -> (i32, i32) {
    %c0_i32 = arith.constant 0 : i32
    return %arg0, %arg1 : i32, i32
  }
}

module attributes {stable_mosaic.version = 11 : i64} {
  func.func @_flash_attn_kernel(%arg0: i32, %arg1: i32, %arg2: i32, %arg3: memref<1x8x8xf32, #tpu.memory_space<vmem>>, %arg4: memref<1x8x8xf32, #tpu.memory_space<vmem>>, %arg5: memref<1x8x8xf32, #tpu.memory_space<vmem>>, %arg6: memref<1x8x8xf32, #tpu.memory_space<vmem>>, %arg7: memref<8x1xf32, #tpu.memory_space<vmem>>, %arg8: memref<8x1xf32, #tpu.memory_space<vmem>>, %arg9: memref<8x8xf32, #tpu.memory_space<vmem>>) attributes {dimension_semantics = [#tpu.dimension_semantics<parallel>, #tpu.dimension_semantics<parallel>, #tpu.dimension_semantics<arbitrary>], iteration_bounds = array<i64: 8, 1, 1>, scalar_prefetch = 0 : i64, scratch_operands = 3 : i64, tpu.core_type = #tpu.core_type<tc>, window_params = [{transform_indices = @transform_0, window_bounds = array<i64: 1, 8, 8>}, {transform_indices = @transform_1, window_bounds = array<i64: 1, 8, 8>}, {transform_indices = @transform_2, window_bounds = array<i64: 1, 8, 8>}, {transform_indices = @transform_3, window_bounds = array<i64: 1, 8, 8>}]} {
    %c0_i32 = arith.constant 0 : i32
    %0 = arith.cmpi eq, %arg2, %c0_i32 : i32
    %1 = arith.extui %0 : i1 to i32
    %c0_i32_0 = arith.constant 0 : i32
    %2 = arith.cmpi ne, %1, %c0_i32_0 : i32
    scf.if %2 {
      %cst_29 = arith.constant 0xFF800000 : f32
      %52 = vector.broadcast %cst_29 : f32 to vector<8x1xf32>
      %c0_30 = arith.constant 0 : index
      %c0_31 = arith.constant 0 : index
      %53 = vector.load %arg7[%c0_30, %c0_31] : memref<8x1xf32, #tpu.memory_space<vmem>>, vector<8x1xf32>
      tpu.vector_store %arg7[%c0_30, %c0_31], %52 {strides = array<i32>} : memref<8x1xf32, #tpu.memory_space<vmem>>, vector<8x1xf32>,
      %cst_32 = arith.constant 0.000000e+00 : f32
      %54 = vector.broadcast %cst_32 : f32 to vector<8x1xf32>
      %c0_33 = arith.constant 0 : index
      %c0_34 = arith.constant 0 : index
      %55 = vector.load %arg8[%c0_33, %c0_34] : memref<8x1xf32, #tpu.memory_space<vmem>>, vector<8x1xf32>
      tpu.vector_store %arg8[%c0_33, %c0_34], %54 {strides = array<i32>} : memref<8x1xf32, #tpu.memory_space<vmem>>, vector<8x1xf32>,
      %cst_35 = arith.constant 0.000000e+00 : f32
      %56 = vector.broadcast %cst_35 : f32 to vector<8x8xf32>
      %c0_36 = arith.constant 0 : index
      %c0_37 = arith.constant 0 : index
      %57 = vector.load %arg9[%c0_36, %c0_37] : memref<8x8xf32, #tpu.memory_space<vmem>>, vector<8x8xf32>
      tpu.vector_store %arg9[%c0_36, %c0_37], %56 {strides = array<i32>} : memref<8x8xf32, #tpu.memory_space<vmem>>, vector<8x8xf32>,
    } else {
    }
    %c0 = arith.constant 0 : index
    %c0_1 = arith.constant 0 : index
    %c0_2 = arith.constant 0 : index
    %3 = vector.load %arg3[%c0, %c0_1, %c0_2] : memref<1x8x8xf32, #tpu.memory_space<vmem>>, vector<1x8x8xf32>
    %4 = vector.shape_cast %3 : vector<1x8x8xf32> to vector<8x8xf32>
    %5 = arith.truncf %4 : vector<8x8xf32> to vector<8x8xbf16>
    %c0_3 = arith.constant 0 : index
    %c0_4 = arith.constant 0 : index
    %c0_5 = arith.constant 0 : index
    %6 = vector.load %arg4[%c0_3, %c0_4, %c0_5] : memref<1x8x8xf32, #tpu.memory_space<vmem>>, vector<1x8x8xf32>
    %7 = vector.shape_cast %6 : vector<1x8x8xf32> to vector<8x8xf32>
    %8 = arith.truncf %7 : vector<8x8xf32> to vector<8x8xbf16>
    %cst = arith.constant dense<0.000000e+00> : vector<8x8xf32>
    %9 = tpu.matmul %5, %8, %cst {dimension_numbers = #tpu.dot_dimension_numbers<[1], [1], [0], [0], [0, 0, 1, 0], [], []>} : vector<8x8xbf16>, vector<8x8xbf16>, vector<8x8xf32> -> vector<8x8xf32>
    %cst_6 = arith.constant 0.353553385 : f32
    %10 = vector.broadcast %cst_6 : f32 to vector<8x8xf32>
    %11 = arith.mulf %9, %10 : vector<8x8xf32>
    %c8_i32 = arith.constant 8 : i32
    %12 = arith.muli %arg1, %c8_i32 : i32
    %13 = tpu.iota {dimensions = array<i32: 0>} : vector<8x8xi32>
    %14 = vector.broadcast %12 : i32 to vector<8x8xi32>
    %15 = arith.addi %14, %13 : vector<8x8xi32>
    %c8_i32_7 = arith.constant 8 : i32
    %16 = arith.muli %arg2, %c8_i32_7 : i32
    %17 = tpu.iota {dimensions = array<i32: 1>} : vector<8x8xi32>
    %18 = vector.broadcast %16 : i32 to vector<8x8xi32>
    %19 = arith.addi %18, %17 : vector<8x8xi32>
    %20 = arith.cmpi sge, %15, %19 : vector<8x8xi32>
    %cst_8 = arith.constant -1.000000e+30 : f32
    %21 = vector.broadcast %cst_8 : f32 to vector<8x8xf32>
    %22 = arith.select %20, %11, %21 : vector<8x8xi1>, vector<8x8xf32>
    %c0_9 = arith.constant 0 : index
    %c0_10 = arith.constant 0 : index
    %23 = vector.load %arg7[%c0_9, %c0_10] : memref<8x1xf32, #tpu.memory_space<vmem>>, vector<8x1xf32>
    %cst_11 = arith.constant dense<0xFF800000> : vector<8xf32>
    %24 = vector.multi_reduction <maximumf>, %22, %cst_11 [1] : vector<8x8xf32> to vector<8xf32>
    %25 = vector.shape_cast %24 : vector<8xf32> to vector<8x1xf32>
    %26 = arith.maximumf %23, %25 : vector<8x1xf32>
    %27 = arith.subf %23, %26 : vector<8x1xf32>
    %28 = math.exp %27 : vector<8x1xf32>
    %29 = vector.broadcast %26 : vector<8x1xf32> to vector<8x8xf32>
    %30 = arith.subf %22, %29 : vector<8x8xf32>
    %31 = math.exp %30 : vector<8x8xf32>
    %c0_12 = arith.constant 0 : index
    %c0_13 = arith.constant 0 : index
    %32 = vector.load %arg8[%c0_12, %c0_13] : memref<8x1xf32, #tpu.memory_space<vmem>>, vector<8x1xf32>
    %33 = arith.mulf %28, %32 : vector<8x1xf32>
    %cst_14 = arith.constant dense<0.000000e+00> : vector<8xf32>
    %34 = vector.multi_reduction <add>, %31, %cst_14 [1] : vector<8x8xf32> to vector<8xf32>
    %35 = vector.shape_cast %34 : vector<8xf32> to vector<8x1xf32>
    %36 = arith.addf %33, %35 : vector<8x1xf32>
    %c0_15 = arith.constant 0 : index
    %c0_16 = arith.constant 0 : index
    %37 = vector.load %arg8[%c0_15, %c0_16] : memref<8x1xf32, #tpu.memory_space<vmem>>, vector<8x1xf32>
    tpu.vector_store %arg8[%c0_15, %c0_16], %36 {strides = array<i32>} : memref<8x1xf32, #tpu.memory_space<vmem>>, vector<8x1xf32>,
    %38 = arith.truncf %31 : vector<8x8xf32> to vector<8x8xbf16>
    %c0_17 = arith.constant 0 : index
    %c0_18 = arith.constant 0 : index
    %c0_19 = arith.constant 0 : index
    %39 = vector.load %arg5[%c0_17, %c0_18, %c0_19] : memref<1x8x8xf32, #tpu.memory_space<vmem>>, vector<1x8x8xf32>
    %40 = vector.shape_cast %39 : vector<1x8x8xf32> to vector<8x8xf32>
    %41 = arith.truncf %40 : vector<8x8xf32> to vector<8x8xbf16>
    %cst_20 = arith.constant dense<0.000000e+00> : vector<8x8xf32>
    %42 = tpu.matmul %38, %41, %cst_20 {dimension_numbers = #tpu.dot_dimension_numbers<[1], [0], [0], [1], [0, 0, 1, 1], [], []>} : vector<8x8xbf16>, vector<8x8xbf16>, vector<8x8xf32> -> vector<8x8xf32>
    %c0_21 = arith.constant 0 : index
    %c0_22 = arith.constant 0 : index
    %43 = vector.load %arg9[%c0_21, %c0_22] : memref<8x8xf32, #tpu.memory_space<vmem>>, vector<8x8xf32>
    %44 = vector.broadcast %28 : vector<8x1xf32> to vector<8x8xf32>
    %45 = arith.mulf %44, %43 : vector<8x8xf32>
    %46 = arith.addf %45, %42 : vector<8x8xf32>
    %c0_23 = arith.constant 0 : index
    %c0_24 = arith.constant 0 : index
    %47 = vector.load %arg9[%c0_23, %c0_24] : memref<8x8xf32, #tpu.memory_space<vmem>>, vector<8x8xf32>
    tpu.vector_store %arg9[%c0_23, %c0_24], %46 {strides = array<i32>} : memref<8x8xf32, #tpu.memory_space<vmem>>, vector<8x8xf32>,
    %c0_25 = arith.constant 0 : index
    %c0_26 = arith.constant 0 : index
    %48 = vector.load %arg7[%c0_25, %c0_26] : memref<8x1xf32, #tpu.memory_space<vmem>>, vector<8x1xf32>
    tpu.vector_store %arg7[%c0_25, %c0_26], %26 {strides = array<i32>} : memref<8x1xf32, #tpu.memory_space<vmem>>, vector<8x1xf32>,
    %c0_i32_27 = arith.constant 0 : i32
    %49 = arith.cmpi eq, %arg2, %c0_i32_27 : i32
    %50 = arith.extui %49 : i1 to i32
    %c0_i32_28 = arith.constant 0 : i32
    %51 = arith.cmpi ne, %50, %c0_i32_28 : i32
    scf.if %51 {
      %c0_29 = arith.constant 0 : index
      %c0_30 = arith.constant 0 : index
      %52 = vector.load %arg8[%c0_29, %c0_30] : memref<8x1xf32, #tpu.memory_space<vmem>>, vector<8x1xf32>
      %53 = tpu.reciprocal %52 {approx = true} : vector<8x1xf32> -> vector<8x1xf32>
      %c0_31 = arith.constant 0 : index
      %c0_32 = arith.constant 0 : index
      %54 = vector.load %arg9[%c0_31, %c0_32] : memref<8x8xf32, #tpu.memory_space<vmem>>, vector<8x8xf32>
      %55 = vector.broadcast %53 : vector<8x1xf32> to vector<8x8xf32>
      %56 = arith.mulf %54, %55 : vector<8x8xf32>
      %c0_33 = arith.constant 0 : index
      %c0_34 = arith.constant 0 : index
      %c0_35 = arith.constant 0 : index
      %57 = vector.load %arg6[%c0_33, %c0_34, %c0_35] : memref<1x8x8xf32, #tpu.memory_space<vmem>>, vector<1x8x8xf32>
      %58 = vector.shape_cast %57 : vector<1x8x8xf32> to vector<8x8xf32>
      %59 = vector.shape_cast %56 : vector<8x8xf32> to vector<1x8x8xf32>
      tpu.vector_store %arg6[%c0_33, %c0_34, %c0_35], %59 {strides = array<i32>} : memref<1x8x8xf32, #tpu.memory_space<vmem>>, vector<1x8x8xf32>,
    } else {
    }
    return
  }
  func.func @transform_0(%arg0: i32, %arg1: i32, %arg2: i32) -> (i32, i32, i32) {
    %c0_i32 = arith.constant 0 : i32
    %c0_i32_0 = arith.constant 0 : i32
    return %arg0, %arg1, %c0_i32 : i32, i32, i32
  }
  func.func @transform_1(%arg0: i32, %arg1: i32, %arg2: i32) -> (i32, i32, i32) {
    %c0_i32 = arith.constant 0 : i32
    %c0_i32_0 = arith.constant 0 : i32
    return %arg0, %arg2, %c0_i32 : i32, i32, i32
  }
  func.func @transform_2(%arg0: i32, %arg1: i32, %arg2: i32) -> (i32, i32, i32) {
    %c0_i32 = arith.constant 0 : i32
    %c0_i32_0 = arith.constant 0 : i32
    return %arg0, %arg2, %c0_i32 : i32, i32, i32
  }
  func.func @transform_3(%arg0: i32, %arg1: i32, %arg2: i32) -> (i32, i32, i32) {
    %c0_i32 = arith.constant 0 : i32
    %c0_i32_0 = arith.constant 0 : i32
    return %arg0, %arg1, %c0_i32 : i32, i32, i32
  }
}

module attributes {stable_mosaic.version = 11 : i64} {
  func.func @_dense_kernel(%arg0: i32, %arg1: i32, %arg2: memref<16x32xf32, #tpu.memory_space<vmem>>, %arg3: memref<32x32xf32, #tpu.memory_space<vmem>>, %arg4: memref<1x32xf32, #tpu.memory_space<vmem>>, %arg5: memref<16x32xf32, #tpu.memory_space<vmem>>, %arg6: memref<16x32xf32, #tpu.memory_space<vmem>>) attributes {dimension_semantics = [#tpu.dimension_semantics<parallel>, #tpu.dimension_semantics<parallel>], iteration_bounds = array<i64: 1, 1>, scalar_prefetch = 0 : i64, scratch_operands = 0 : i64, tpu.core_type = #tpu.core_type<tc>, window_params = [{transform_indices = @transform_0, window_bounds = array<i64: 16, 32>}, {transform_indices = @transform_1, window_bounds = array<i64: 32, 32>}, {transform_indices = @transform_2, window_bounds = array<i64: 1, 32>}, {transform_indices = @transform_3, window_bounds = array<i64: 16, 32>}, {transform_indices = @transform_4, window_bounds = array<i64: 16, 32>}]} {
    %c0 = arith.constant 0 : index
    %c0_0 = arith.constant 0 : index
    %0 = vector.load %arg2[%c0, %c0_0] : memref<16x32xf32, #tpu.memory_space<vmem>>, vector<16x32xf32>
    %1 = arith.truncf %0 : vector<16x32xf32> to vector<16x32xbf16>
    %c0_1 = arith.constant 0 : index
    %c0_2 = arith.constant 0 : index
    %2 = vector.load %arg3[%c0_1, %c0_2] : memref<32x32xf32, #tpu.memory_space<vmem>>, vector<32x32xf32>
    %3 = arith.truncf %2 : vector<32x32xf32> to vector<32x32xbf16>
    %cst = arith.constant dense<0.000000e+00> : vector<16x32xf32>
    %4 = tpu.matmul %1, %3, %cst {dimension_numbers = #tpu.dot_dimension_numbers<[1], [0], [0], [1], [0, 0, 1, 1], [], []>} : vector<16x32xbf16>, vector<32x32xbf16>, vector<16x32xf32> -> vector<16x32xf32>
    %c0_3 = arith.constant 0 : index
    %c0_4 = arith.constant 0 : index
    %5 = vector.load %arg4[%c0_3, %c0_4] : memref<1x32xf32, #tpu.memory_space<vmem>>, vector<1x32xf32>
    %6 = vector.broadcast %5 : vector<1x32xf32> to vector<16x32xf32>
    %7 = arith.addf %4, %6 : vector<16x32xf32>
    %c0_5 = arith.constant 0 : index
    %c0_6 = arith.constant 0 : index
    %8 = vector.load %arg5[%c0_5, %c0_6] : memref<16x32xf32, #tpu.memory_space<vmem>>, vector<16x32xf32>
    %9 = arith.addf %7, %8 : vector<16x32xf32>
    %c0_7 = arith.constant 0 : index
    %c0_8 = arith.constant 0 : index
    %10 = vector.load %arg6[%c0_7, %c0_8] : memref<16x32xf32, #tpu.memory_space<vmem>>, vector<16x32xf32>
    tpu.vector_store %arg6[%c0_7, %c0_8], %9 {strides = array<i32>} : memref<16x32xf32, #tpu.memory_space<vmem>>, vector<16x32xf32>,
    return
  }
  func.func @transform_0(%arg0: i32, %arg1: i32) -> (i32, i32) {
    %c0_i32 = arith.constant 0 : i32
    %c0_i32_0 = arith.constant 0 : i32
    return %arg0, %c0_i32 : i32, i32
  }
  func.func @transform_1(%arg0: i32, %arg1: i32) -> (i32, i32) {
    %c0_i32 = arith.constant 0 : i32
    %c0_i32_0 = arith.constant 0 : i32
    return %c0_i32, %arg1 : i32, i32
  }
  func.func @transform_2(%arg0: i32, %arg1: i32) -> (i32, i32) {
    %c0_i32 = arith.constant 0 : i32
    %c0_i32_0 = arith.constant 0 : i32
    return %c0_i32, %arg1 : i32, i32
  }
  func.func @transform_3(%arg0: i32, %arg1: i32) -> (i32, i32) {
    %c0_i32 = arith.constant 0 : i32
    return %arg0, %arg1 : i32, i32
  }
  func.func @transform_4(%arg0: i32, %arg1: i32) -> (i32, i32) {
    %c0_i32 = arith.constant 0 : i32
    return %arg0, %arg1 : i32, i32
  }
}

module attributes {stable_mosaic.version = 11 : i64} {
  func.func @_dense_kernel(%arg0: i32, %arg1: i32, %arg2: memref<16x32xf32, #tpu.memory_space<vmem>>, %arg3: memref<32x32xf32, #tpu.memory_space<vmem>>, %arg4: memref<16x32xf32, #tpu.memory_space<vmem>>) attributes {dimension_semantics = [#tpu.dimension_semantics<parallel>, #tpu.dimension_semantics<parallel>], iteration_bounds = array<i64: 1, 1>, scalar_prefetch = 0 : i64, scratch_operands = 0 : i64, tpu.core_type = #tpu.core_type<tc>, window_params = [{transform_indices = @transform_0, window_bounds = array<i64: 16, 32>}, {transform_indices = @transform_1, window_bounds = array<i64: 32, 32>}, {transform_indices = @transform_2, window_bounds = array<i64: 16, 32>}]} {
    %c0 = arith.constant 0 : index
    %c0_0 = arith.constant 0 : index
    %0 = vector.load %arg2[%c0, %c0_0] : memref<16x32xf32, #tpu.memory_space<vmem>>, vector<16x32xf32>
    %1 = arith.truncf %0 : vector<16x32xf32> to vector<16x32xbf16>
    %c0_1 = arith.constant 0 : index
    %c0_2 = arith.constant 0 : index
    %2 = vector.load %arg3[%c0_1, %c0_2] : memref<32x32xf32, #tpu.memory_space<vmem>>, vector<32x32xf32>
    %3 = arith.truncf %2 : vector<32x32xf32> to vector<32x32xbf16>
    %cst = arith.constant dense<0.000000e+00> : vector<16x32xf32>
    %4 = tpu.matmul %1, %3, %cst {dimension_numbers = #tpu.dot_dimension_numbers<[1], [0], [0], [1], [0, 0, 1, 1], [], []>} : vector<16x32xbf16>, vector<32x32xbf16>, vector<16x32xf32> -> vector<16x32xf32>
    %c0_3 = arith.constant 0 : index
    %c0_4 = arith.constant 0 : index
    %5 = vector.load %arg4[%c0_3, %c0_4] : memref<16x32xf32, #tpu.memory_space<vmem>>, vector<16x32xf32>
    tpu.vector_store %arg4[%c0_3, %c0_4], %4 {strides = array<i32>} : memref<16x32xf32, #tpu.memory_space<vmem>>, vector<16x32xf32>,
    return
  }
  func.func @transform_0(%arg0: i32, %arg1: i32) -> (i32, i32) {
    %c0_i32 = arith.constant 0 : i32
    %c0_i32_0 = arith.constant 0 : i32
    return %arg0, %c0_i32 : i32, i32
  }
  func.func @transform_1(%arg0: i32, %arg1: i32) -> (i32, i32) {
    %c0_i32 = arith.constant 0 : i32
    %c0_i32_0 = arith.constant 0 : i32
    return %c0_i32, %arg1 : i32, i32
  }
  func.func @transform_2(%arg0: i32, %arg1: i32) -> (i32, i32) {
    %c0_i32 = arith.constant 0 : i32
    return %arg0, %arg1 : i32, i32
  }
}

module attributes {stable_mosaic.version = 11 : i64} {
  func.func @_flash_attn_kernel(%arg0: i32, %arg1: i32, %arg2: i32, %arg3: memref<1x8x8xf32, #tpu.memory_space<vmem>>, %arg4: memref<1x8x8xf32, #tpu.memory_space<vmem>>, %arg5: memref<1x8x8xf32, #tpu.memory_space<vmem>>, %arg6: memref<1x8x8xf32, #tpu.memory_space<vmem>>, %arg7: memref<8x1xf32, #tpu.memory_space<vmem>>, %arg8: memref<8x1xf32, #tpu.memory_space<vmem>>, %arg9: memref<8x8xf32, #tpu.memory_space<vmem>>) attributes {dimension_semantics = [#tpu.dimension_semantics<parallel>, #tpu.dimension_semantics<parallel>, #tpu.dimension_semantics<arbitrary>], iteration_bounds = array<i64: 8, 1, 1>, scalar_prefetch = 0 : i64, scratch_operands = 3 : i64, tpu.core_type = #tpu.core_type<tc>, window_params = [{transform_indices = @transform_0, window_bounds = array<i64: 1, 8, 8>}, {transform_indices = @transform_1, window_bounds = array<i64: 1, 8, 8>}, {transform_indices = @transform_2, window_bounds = array<i64: 1, 8, 8>}, {transform_indices = @transform_3, window_bounds = array<i64: 1, 8, 8>}]} {
    %c0_i32 = arith.constant 0 : i32
    %0 = arith.cmpi eq, %arg2, %c0_i32 : i32
    %1 = arith.extui %0 : i1 to i32
    %c0_i32_0 = arith.constant 0 : i32
    %2 = arith.cmpi ne, %1, %c0_i32_0 : i32
    scf.if %2 {
      %cst_27 = arith.constant 0xFF800000 : f32
      %41 = vector.broadcast %cst_27 : f32 to vector<8x1xf32>
      %c0_28 = arith.constant 0 : index
      %c0_29 = arith.constant 0 : index
      %42 = vector.load %arg7[%c0_28, %c0_29] : memref<8x1xf32, #tpu.memory_space<vmem>>, vector<8x1xf32>
      tpu.vector_store %arg7[%c0_28, %c0_29], %41 {strides = array<i32>} : memref<8x1xf32, #tpu.memory_space<vmem>>, vector<8x1xf32>,
      %cst_30 = arith.constant 0.000000e+00 : f32
      %43 = vector.broadcast %cst_30 : f32 to vector<8x1xf32>
      %c0_31 = arith.constant 0 : index
      %c0_32 = arith.constant 0 : index
      %44 = vector.load %arg8[%c0_31, %c0_32] : memref<8x1xf32, #tpu.memory_space<vmem>>, vector<8x1xf32>
      tpu.vector_store %arg8[%c0_31, %c0_32], %43 {strides = array<i32>} : memref<8x1xf32, #tpu.memory_space<vmem>>, vector<8x1xf32>,
      %cst_33 = arith.constant 0.000000e+00 : f32
      %45 = vector.broadcast %cst_33 : f32 to vector<8x8xf32>
      %c0_34 = arith.constant 0 : index
      %c0_35 = arith.constant 0 : index
      %46 = vector.load %arg9[%c0_34, %c0_35] : memref<8x8xf32, #tpu.memory_space<vmem>>, vector<8x8xf32>
      tpu.vector_store %arg9[%c0_34, %c0_35], %45 {strides = array<i32>} : memref<8x8xf32, #tpu.memory_space<vmem>>, vector<8x8xf32>,
    } else {
    }
    %c0 = arith.constant 0 : index
    %c0_1 = arith.constant 0 : index
    %c0_2 = arith.constant 0 : index
    %3 = vector.load %arg3[%c0, %c0_1, %c0_2] : memref<1x8x8xf32, #tpu.memory_space<vmem>>, vector<1x8x8xf32>
    %4 = vector.shape_cast %3 : vector<1x8x8xf32> to vector<8x8xf32>
    %5 = arith.truncf %4 : vector<8x8xf32> to vector<8x8xbf16>
    %c0_3 = arith.constant 0 : index
    %c0_4 = arith.constant 0 : index
    %c0_5 = arith.constant 0 : index
    %6 = vector.load %arg4[%c0_3, %c0_4, %c0_5] : memref<1x8x8xf32, #tpu.memory_space<vmem>>, vector<1x8x8xf32>
    %7 = vector.shape_cast %6 : vector<1x8x8xf32> to vector<8x8xf32>
    %8 = arith.truncf %7 : vector<8x8xf32> to vector<8x8xbf16>
    %cst = arith.constant dense<0.000000e+00> : vector<8x8xf32>
    %9 = tpu.matmul %5, %8, %cst {dimension_numbers = #tpu.dot_dimension_numbers<[1], [1], [0], [0], [0, 0, 1, 0], [], []>} : vector<8x8xbf16>, vector<8x8xbf16>, vector<8x8xf32> -> vector<8x8xf32>
    %cst_6 = arith.constant 0.353553385 : f32
    %10 = vector.broadcast %cst_6 : f32 to vector<8x8xf32>
    %11 = arith.mulf %9, %10 : vector<8x8xf32>
    %c0_7 = arith.constant 0 : index
    %c0_8 = arith.constant 0 : index
    %12 = vector.load %arg7[%c0_7, %c0_8] : memref<8x1xf32, #tpu.memory_space<vmem>>, vector<8x1xf32>
    %cst_9 = arith.constant dense<0xFF800000> : vector<8xf32>
    %13 = vector.multi_reduction <maximumf>, %11, %cst_9 [1] : vector<8x8xf32> to vector<8xf32>
    %14 = vector.shape_cast %13 : vector<8xf32> to vector<8x1xf32>
    %15 = arith.maximumf %12, %14 : vector<8x1xf32>
    %16 = arith.subf %12, %15 : vector<8x1xf32>
    %17 = math.exp %16 : vector<8x1xf32>
    %18 = vector.broadcast %15 : vector<8x1xf32> to vector<8x8xf32>
    %19 = arith.subf %11, %18 : vector<8x8xf32>
    %20 = math.exp %19 : vector<8x8xf32>
    %c0_10 = arith.constant 0 : index
    %c0_11 = arith.constant 0 : index
    %21 = vector.load %arg8[%c0_10, %c0_11] : memref<8x1xf32, #tpu.memory_space<vmem>>, vector<8x1xf32>
    %22 = arith.mulf %17, %21 : vector<8x1xf32>
    %cst_12 = arith.constant dense<0.000000e+00> : vector<8xf32>
    %23 = vector.multi_reduction <add>, %20, %cst_12 [1] : vector<8x8xf32> to vector<8xf32>
    %24 = vector.shape_cast %23 : vector<8xf32> to vector<8x1xf32>
    %25 = arith.addf %22, %24 : vector<8x1xf32>
    %c0_13 = arith.constant 0 : index
    %c0_14 = arith.constant 0 : index
    %26 = vector.load %arg8[%c0_13, %c0_14] : memref<8x1xf32, #tpu.memory_space<vmem>>, vector<8x1xf32>
    tpu.vector_store %arg8[%c0_13, %c0_14], %25 {strides = array<i32>} : memref<8x1xf32, #tpu.memory_space<vmem>>, vector<8x1xf32>,
    %27 = arith.truncf %20 : vector<8x8xf32> to vector<8x8xbf16>
    %c0_15 = arith.constant 0 : index
    %c0_16 = arith.constant 0 : index
    %c0_17 = arith.constant 0 : index
    %28 = vector.load %arg5[%c0_15, %c0_16, %c0_17] : memref<1x8x8xf32, #tpu.memory_space<vmem>>, vector<1x8x8xf32>
    %29 = vector.shape_cast %28 : vector<1x8x8xf32> to vector<8x8xf32>
    %30 = arith.truncf %29 : vector<8x8xf32> to vector<8x8xbf16>
    %cst_18 = arith.constant dense<0.000000e+00> : vector<8x8xf32>
    %31 = tpu.matmul %27, %30, %cst_18 {dimension_numbers = #tpu.dot_dimension_numbers<[1], [0], [0], [1], [0, 0, 1, 1], [], []>} : vector<8x8xbf16>, vector<8x8xbf16>, vector<8x8xf32> -> vector<8x8xf32>
    %c0_19 = arith.constant 0 : index
    %c0_20 = arith.constant 0 : index
    %32 = vector.load %arg9[%c0_19, %c0_20] : memref<8x8xf32, #tpu.memory_space<vmem>>, vector<8x8xf32>
    %33 = vector.broadcast %17 : vector<8x1xf32> to vector<8x8xf32>
    %34 = arith.mulf %33, %32 : vector<8x8xf32>
    %35 = arith.addf %34, %31 : vector<8x8xf32>
    %c0_21 = arith.constant 0 : index
    %c0_22 = arith.constant 0 : index
    %36 = vector.load %arg9[%c0_21, %c0_22] : memref<8x8xf32, #tpu.memory_space<vmem>>, vector<8x8xf32>
    tpu.vector_store %arg9[%c0_21, %c0_22], %35 {strides = array<i32>} : memref<8x8xf32, #tpu.memory_space<vmem>>, vector<8x8xf32>,
    %c0_23 = arith.constant 0 : index
    %c0_24 = arith.constant 0 : index
    %37 = vector.load %arg7[%c0_23, %c0_24] : memref<8x1xf32, #tpu.memory_space<vmem>>, vector<8x1xf32>
    tpu.vector_store %arg7[%c0_23, %c0_24], %15 {strides = array<i32>} : memref<8x1xf32, #tpu.memory_space<vmem>>, vector<8x1xf32>,
    %c0_i32_25 = arith.constant 0 : i32
    %38 = arith.cmpi eq, %arg2, %c0_i32_25 : i32
    %39 = arith.extui %38 : i1 to i32
    %c0_i32_26 = arith.constant 0 : i32
    %40 = arith.cmpi ne, %39, %c0_i32_26 : i32
    scf.if %40 {
      %c0_27 = arith.constant 0 : index
      %c0_28 = arith.constant 0 : index
      %41 = vector.load %arg8[%c0_27, %c0_28] : memref<8x1xf32, #tpu.memory_space<vmem>>, vector<8x1xf32>
      %42 = tpu.reciprocal %41 {approx = true} : vector<8x1xf32> -> vector<8x1xf32>
      %c0_29 = arith.constant 0 : index
      %c0_30 = arith.constant 0 : index
      %43 = vector.load %arg9[%c0_29, %c0_30] : memref<8x8xf32, #tpu.memory_space<vmem>>, vector<8x8xf32>
      %44 = vector.broadcast %42 : vector<8x1xf32> to vector<8x8xf32>
      %45 = arith.mulf %43, %44 : vector<8x8xf32>
      %c0_31 = arith.constant 0 : index
      %c0_32 = arith.constant 0 : index
      %c0_33 = arith.constant 0 : index
      %46 = vector.load %arg6[%c0_31, %c0_32, %c0_33] : memref<1x8x8xf32, #tpu.memory_space<vmem>>, vector<1x8x8xf32>
      %47 = vector.shape_cast %46 : vector<1x8x8xf32> to vector<8x8xf32>
      %48 = vector.shape_cast %45 : vector<8x8xf32> to vector<1x8x8xf32>
      tpu.vector_store %arg6[%c0_31, %c0_32, %c0_33], %48 {strides = array<i32>} : memref<1x8x8xf32, #tpu.memory_space<vmem>>, vector<1x8x8xf32>,
    } else {
    }
    return
  }
  func.func @transform_0(%arg0: i32, %arg1: i32, %arg2: i32) -> (i32, i32, i32) {
    %c0_i32 = arith.constant 0 : i32
    %c0_i32_0 = arith.constant 0 : i32
    return %arg0, %arg1, %c0_i32 : i32, i32, i32
  }
  func.func @transform_1(%arg0: i32, %arg1: i32, %arg2: i32) -> (i32, i32, i32) {
    %c0_i32 = arith.constant 0 : i32
    %c0_i32_0 = arith.constant 0 : i32
    return %arg0, %arg2, %c0_i32 : i32, i32, i32
  }
  func.func @transform_2(%arg0: i32, %arg1: i32, %arg2: i32) -> (i32, i32, i32) {
    %c0_i32 = arith.constant 0 : i32
    %c0_i32_0 = arith.constant 0 : i32
    return %arg0, %arg2, %c0_i32 : i32, i32, i32
  }
  func.func @transform_3(%arg0: i32, %arg1: i32, %arg2: i32) -> (i32, i32, i32) {
    %c0_i32 = arith.constant 0 : i32
    %c0_i32_0 = arith.constant 0 : i32
    return %arg0, %arg1, %c0_i32 : i32, i32, i32
  }
}

module attributes {stable_mosaic.version = 11 : i64} {
  func.func @_dense_kernel(%arg0: i32, %arg1: i32, %arg2: memref<16x32xf32, #tpu.memory_space<vmem>>, %arg3: memref<32x64xf32, #tpu.memory_space<vmem>>, %arg4: memref<1x64xf32, #tpu.memory_space<vmem>>, %arg5: memref<16x64xf32, #tpu.memory_space<vmem>>) attributes {dimension_semantics = [#tpu.dimension_semantics<parallel>, #tpu.dimension_semantics<parallel>], iteration_bounds = array<i64: 1, 1>, scalar_prefetch = 0 : i64, scratch_operands = 0 : i64, tpu.core_type = #tpu.core_type<tc>, window_params = [{transform_indices = @transform_0, window_bounds = array<i64: 16, 32>}, {transform_indices = @transform_1, window_bounds = array<i64: 32, 64>}, {transform_indices = @transform_2, window_bounds = array<i64: 1, 64>}, {transform_indices = @transform_3, window_bounds = array<i64: 16, 64>}]} {
    %c0 = arith.constant 0 : index
    %c0_0 = arith.constant 0 : index
    %0 = vector.load %arg2[%c0, %c0_0] : memref<16x32xf32, #tpu.memory_space<vmem>>, vector<16x32xf32>
    %1 = arith.truncf %0 : vector<16x32xf32> to vector<16x32xbf16>
    %c0_1 = arith.constant 0 : index
    %c0_2 = arith.constant 0 : index
    %2 = vector.load %arg3[%c0_1, %c0_2] : memref<32x64xf32, #tpu.memory_space<vmem>>, vector<32x64xf32>
    %3 = arith.truncf %2 : vector<32x64xf32> to vector<32x64xbf16>
    %cst = arith.constant dense<0.000000e+00> : vector<16x64xf32>
    %4 = tpu.matmul %1, %3, %cst {dimension_numbers = #tpu.dot_dimension_numbers<[1], [0], [0], [1], [0, 0, 1, 1], [], []>} : vector<16x32xbf16>, vector<32x64xbf16>, vector<16x64xf32> -> vector<16x64xf32>
    %c0_3 = arith.constant 0 : index
    %c0_4 = arith.constant 0 : index
    %5 = vector.load %arg4[%c0_3, %c0_4] : memref<1x64xf32, #tpu.memory_space<vmem>>, vector<1x64xf32>
    %6 = vector.broadcast %5 : vector<1x64xf32> to vector<16x64xf32>
    %7 = arith.addf %4, %6 : vector<16x64xf32>
    %cst_5 = arith.constant 5.000000e-01 : f32
    %8 = vector.broadcast %cst_5 : f32 to vector<16x64xf32>
    %9 = arith.mulf %8, %7 : vector<16x64xf32>
    %cst_6 = arith.constant 0.707106769 : f32
    %10 = vector.broadcast %cst_6 : f32 to vector<16x64xf32>
    %11 = arith.mulf %7, %10 : vector<16x64xf32>
    %12 = math.erf %11 : vector<16x64xf32>
    %cst_7 = arith.constant 1.000000e+00 : f32
    %13 = vector.broadcast %cst_7 : f32 to vector<16x64xf32>
    %14 = arith.addf %13, %12 : vector<16x64xf32>
    %15 = arith.mulf %9, %14 : vector<16x64xf32>
    %c0_8 = arith.constant 0 : index
    %c0_9 = arith.constant 0 : index
    %16 = vector.load %arg5[%c0_8, %c0_9] : memref<16x64xf32, #tpu.memory_space<vmem>>, vector<16x64xf32>
    tpu.vector_store %arg5[%c0_8, %c0_9], %15 {strides = array<i32>} : memref<16x64xf32, #tpu.memory_space<vmem>>, vector<16x64xf32>,
    return
  }
  func.func @transform_0(%arg0: i32, %arg1: i32) -> (i32, i32) {
    %c0_i32 = arith.constant 0 : i32
    %c0_i32_0 = arith.constant 0 : i32
    return %arg0, %c0_i32 : i32, i32
  }
  func.func @transform_1(%arg0: i32, %arg1: i32) -> (i32, i32) {
    %c0_i32 = arith.constant 0 : i32
    %c0_i32_0 = arith.constant 0 : i32
    return %c0_i32, %arg1 : i32, i32
  }
  func.func @transform_2(%arg0: i32, %arg1: i32) -> (i32, i32) {
    %c0_i32 = arith.constant 0 : i32
    %c0_i32_0 = arith.constant 0 : i32
    return %c0_i32, %arg1 : i32, i32
  }
  func.func @transform_3(%arg0: i32, %arg1: i32) -> (i32, i32) {
    %c0_i32 = arith.constant 0 : i32
    return %arg0, %arg1 : i32, i32
  }
}

module attributes {stable_mosaic.version = 11 : i64} {
  func.func @_dense_kernel(%arg0: i32, %arg1: i32, %arg2: memref<16x64xf32, #tpu.memory_space<vmem>>, %arg3: memref<64x32xf32, #tpu.memory_space<vmem>>, %arg4: memref<1x32xf32, #tpu.memory_space<vmem>>, %arg5: memref<16x32xf32, #tpu.memory_space<vmem>>, %arg6: memref<16x32xf32, #tpu.memory_space<vmem>>) attributes {dimension_semantics = [#tpu.dimension_semantics<parallel>, #tpu.dimension_semantics<parallel>], iteration_bounds = array<i64: 1, 1>, scalar_prefetch = 0 : i64, scratch_operands = 0 : i64, tpu.core_type = #tpu.core_type<tc>, window_params = [{transform_indices = @transform_0, window_bounds = array<i64: 16, 64>}, {transform_indices = @transform_1, window_bounds = array<i64: 64, 32>}, {transform_indices = @transform_2, window_bounds = array<i64: 1, 32>}, {transform_indices = @transform_3, window_bounds = array<i64: 16, 32>}, {transform_indices = @transform_4, window_bounds = array<i64: 16, 32>}]} {
    %c0 = arith.constant 0 : index
    %c0_0 = arith.constant 0 : index
    %0 = vector.load %arg2[%c0, %c0_0] : memref<16x64xf32, #tpu.memory_space<vmem>>, vector<16x64xf32>
    %1 = arith.truncf %0 : vector<16x64xf32> to vector<16x64xbf16>
    %c0_1 = arith.constant 0 : index
    %c0_2 = arith.constant 0 : index
    %2 = vector.load %arg3[%c0_1, %c0_2] : memref<64x32xf32, #tpu.memory_space<vmem>>, vector<64x32xf32>
    %3 = arith.truncf %2 : vector<64x32xf32> to vector<64x32xbf16>
    %cst = arith.constant dense<0.000000e+00> : vector<16x32xf32>
    %4 = tpu.matmul %1, %3, %cst {dimension_numbers = #tpu.dot_dimension_numbers<[1], [0], [0], [1], [0, 0, 1, 1], [], []>} : vector<16x64xbf16>, vector<64x32xbf16>, vector<16x32xf32> -> vector<16x32xf32>
    %c0_3 = arith.constant 0 : index
    %c0_4 = arith.constant 0 : index
    %5 = vector.load %arg4[%c0_3, %c0_4] : memref<1x32xf32, #tpu.memory_space<vmem>>, vector<1x32xf32>
    %6 = vector.broadcast %5 : vector<1x32xf32> to vector<16x32xf32>
    %7 = arith.addf %4, %6 : vector<16x32xf32>
    %c0_5 = arith.constant 0 : index
    %c0_6 = arith.constant 0 : index
    %8 = vector.load %arg5[%c0_5, %c0_6] : memref<16x32xf32, #tpu.memory_space<vmem>>, vector<16x32xf32>
    %9 = arith.addf %7, %8 : vector<16x32xf32>
    %c0_7 = arith.constant 0 : index
    %c0_8 = arith.constant 0 : index
    %10 = vector.load %arg6[%c0_7, %c0_8] : memref<16x32xf32, #tpu.memory_space<vmem>>, vector<16x32xf32>
    tpu.vector_store %arg6[%c0_7, %c0_8], %9 {strides = array<i32>} : memref<16x32xf32, #tpu.memory_space<vmem>>, vector<16x32xf32>,
    return
  }
  func.func @transform_0(%arg0: i32, %arg1: i32) -> (i32, i32) {
    %c0_i32 = arith.constant 0 : i32
    %c0_i32_0 = arith.constant 0 : i32
    return %arg0, %c0_i32 : i32, i32
  }
  func.func @transform_1(%arg0: i32, %arg1: i32) -> (i32, i32) {
    %c0_i32 = arith.constant 0 : i32
    %c0_i32_0 = arith.constant 0 : i32
    return %c0_i32, %arg1 : i32, i32
  }
  func.func @transform_2(%arg0: i32, %arg1: i32) -> (i32, i32) {
    %c0_i32 = arith.constant 0 : i32
    %c0_i32_0 = arith.constant 0 : i32
    return %c0_i32, %arg1 : i32, i32
  }
  func.func @transform_3(%arg0: i32, %arg1: i32) -> (i32, i32) {
    %c0_i32 = arith.constant 0 : i32
    return %arg0, %arg1 : i32, i32
  }
  func.func @transform_4(%arg0: i32, %arg1: i32) -> (i32, i32) {
    %c0_i32 = arith.constant 0 : i32
    return %arg0, %arg1 : i32, i32
  }
}

module attributes {stable_mosaic.version = 11 : i64} {
  func.func @_dense_kernel(%arg0: i32, %arg1: i32, %arg2: memref<16x32xf32, #tpu.memory_space<vmem>>, %arg3: memref<32x64xf32, #tpu.memory_space<vmem>>, %arg4: memref<16x64xf32, #tpu.memory_space<vmem>>) attributes {dimension_semantics = [#tpu.dimension_semantics<parallel>, #tpu.dimension_semantics<parallel>], iteration_bounds = array<i64: 1, 1>, scalar_prefetch = 0 : i64, scratch_operands = 0 : i64, tpu.core_type = #tpu.core_type<tc>, window_params = [{transform_indices = @transform_0, window_bounds = array<i64: 16, 32>}, {transform_indices = @transform_1, window_bounds = array<i64: 32, 64>}, {transform_indices = @transform_2, window_bounds = array<i64: 16, 64>}]} {
    %c0 = arith.constant 0 : index
    %c0_0 = arith.constant 0 : index
    %0 = vector.load %arg2[%c0, %c0_0] : memref<16x32xf32, #tpu.memory_space<vmem>>, vector<16x32xf32>
    %1 = arith.truncf %0 : vector<16x32xf32> to vector<16x32xbf16>
    %c0_1 = arith.constant 0 : index
    %c0_2 = arith.constant 0 : index
    %2 = vector.load %arg3[%c0_1, %c0_2] : memref<32x64xf32, #tpu.memory_space<vmem>>, vector<32x64xf32>
    %3 = arith.truncf %2 : vector<32x64xf32> to vector<32x64xbf16>
    %cst = arith.constant dense<0.000000e+00> : vector<16x64xf32>
    %4 = tpu.matmul %1, %3, %cst {dimension_numbers = #tpu.dot_dimension_numbers<[1], [0], [0], [1], [0, 0, 1, 1], [], []>} : vector<16x32xbf16>, vector<32x64xbf16>, vector<16x64xf32> -> vector<16x64xf32>
    %c0_3 = arith.constant 0 : index
    %c0_4 = arith.constant 0 : index
    %5 = vector.load %arg4[%c0_3, %c0_4] : memref<16x64xf32, #tpu.memory_space<vmem>>, vector<16x64xf32>
    tpu.vector_store %arg4[%c0_3, %c0_4], %4 {strides = array<i32>} : memref<16x64xf32, #tpu.memory_space<vmem>>, vector<16x64xf32>,
    return
  }
  func.func @transform_0(%arg0: i32, %arg1: i32) -> (i32, i32) {
    %c0_i32 = arith.constant 0 : i32
    %c0_i32_0 = arith.constant 0 : i32
    return %arg0, %c0_i32 : i32, i32
  }
  func.func @transform_1(%arg0: i32, %arg1: i32) -> (i32, i32) {
    %c0_i32 = arith.constant 0 : i32
    %c0_i32_0 = arith.constant 0 : i32
    return %c0_i32, %arg1 : i32, i32
  }
  func.func @transform_2(%arg0: i32, %arg1: i32) -> (i32, i32) {
    %c0_i32 = arith.constant 0 : i32
    return %arg0, %arg1 : i32, i32
  }
}

module attributes {stable_mosaic.version = 11 : i64} {
  func.func @_dense_kernel(%arg0: i32, %arg1: i32, %arg2: memref<16x64xf32, #tpu.memory_space<vmem>>, %arg3: memref<64x32xf32, #tpu.memory_space<vmem>>, %arg4: memref<1x32xf32, #tpu.memory_space<vmem>>, %arg5: memref<16x32xf32, #tpu.memory_space<vmem>>, %arg6: memref<16x32xf32, #tpu.memory_space<vmem>>) attributes {dimension_semantics = [#tpu.dimension_semantics<parallel>, #tpu.dimension_semantics<parallel>], iteration_bounds = array<i64: 1, 1>, scalar_prefetch = 0 : i64, scratch_operands = 0 : i64, tpu.core_type = #tpu.core_type<tc>, window_params = [{transform_indices = @transform_0, window_bounds = array<i64: 16, 64>}, {transform_indices = @transform_1, window_bounds = array<i64: 64, 32>}, {transform_indices = @transform_2, window_bounds = array<i64: 1, 32>}, {transform_indices = @transform_3, window_bounds = array<i64: 16, 32>}, {transform_indices = @transform_4, window_bounds = array<i64: 16, 32>}]} {
    %c0 = arith.constant 0 : index
    %c0_0 = arith.constant 0 : index
    %0 = vector.load %arg2[%c0, %c0_0] : memref<16x64xf32, #tpu.memory_space<vmem>>, vector<16x64xf32>
    %1 = arith.truncf %0 : vector<16x64xf32> to vector<16x64xbf16>
    %c0_1 = arith.constant 0 : index
    %c0_2 = arith.constant 0 : index
    %2 = vector.load %arg3[%c0_1, %c0_2] : memref<64x32xf32, #tpu.memory_space<vmem>>, vector<64x32xf32>
    %3 = arith.truncf %2 : vector<64x32xf32> to vector<64x32xbf16>
    %cst = arith.constant dense<0.000000e+00> : vector<16x32xf32>
    %4 = tpu.matmul %1, %3, %cst {dimension_numbers = #tpu.dot_dimension_numbers<[1], [0], [0], [1], [0, 0, 1, 1], [], []>} : vector<16x64xbf16>, vector<64x32xbf16>, vector<16x32xf32> -> vector<16x32xf32>
    %c0_3 = arith.constant 0 : index
    %c0_4 = arith.constant 0 : index
    %5 = vector.load %arg4[%c0_3, %c0_4] : memref<1x32xf32, #tpu.memory_space<vmem>>, vector<1x32xf32>
    %6 = vector.broadcast %5 : vector<1x32xf32> to vector<16x32xf32>
    %7 = arith.addf %4, %6 : vector<16x32xf32>
    %c0_5 = arith.constant 0 : index
    %c0_6 = arith.constant 0 : index
    %8 = vector.load %arg5[%c0_5, %c0_6] : memref<16x32xf32, #tpu.memory_space<vmem>>, vector<16x32xf32>
    %9 = arith.addf %7, %8 : vector<16x32xf32>
    %c0_7 = arith.constant 0 : index
    %c0_8 = arith.constant 0 : index
    %10 = vector.load %arg6[%c0_7, %c0_8] : memref<16x32xf32, #tpu.memory_space<vmem>>, vector<16x32xf32>
    tpu.vector_store %arg6[%c0_7, %c0_8], %9 {strides = array<i32>} : memref<16x32xf32, #tpu.memory_space<vmem>>, vector<16x32xf32>,
    return
  }
  func.func @transform_0(%arg0: i32, %arg1: i32) -> (i32, i32) {
    %c0_i32 = arith.constant 0 : i32
    %c0_i32_0 = arith.constant 0 : i32
    return %arg0, %c0_i32 : i32, i32
  }
  func.func @transform_1(%arg0: i32, %arg1: i32) -> (i32, i32) {
    %c0_i32 = arith.constant 0 : i32
    %c0_i32_0 = arith.constant 0 : i32
    return %c0_i32, %arg1 : i32, i32
  }
  func.func @transform_2(%arg0: i32, %arg1: i32) -> (i32, i32) {
    %c0_i32 = arith.constant 0 : i32
    %c0_i32_0 = arith.constant 0 : i32
    return %c0_i32, %arg1 : i32, i32
  }
  func.func @transform_3(%arg0: i32, %arg1: i32) -> (i32, i32) {
    %c0_i32 = arith.constant 0 : i32
    return %arg0, %arg1 : i32, i32
  }
  func.func @transform_4(%arg0: i32, %arg1: i32) -> (i32, i32) {
    %c0_i32 = arith.constant 0 : i32
    return %arg0, %arg1 : i32, i32
  }
}

</mosaic_0001>

<bundles_post_ra>
// kernel: transformer_forward.52
= control target key start
LH: loop header
LB: loop body
LE: loop exit
PB: predicated region body
PF: predicated region fallthrough
CT: control target
= control target key end

     0   :  { %vm16_vm0 = vcmask 261120   ;;  %s118_s0 = inlined_call_operand.vmem [shape: f32[16,32], index: 0, kind: input, shape index: {}]   ;;  %s119_s1 = inlined_call_operand.vmem [shape: f32[1,32], index: 1, kind: input, shape index: {}]   ;;  %s120_s2 = inlined_call_operand.vmem [shape: f32[1,32], index: 2, kind: input, shape index: {}]   ;;  %s121_s3 = inlined_call_operand.vmem [shape: f32[16,32], index: 3, kind: output, shape index: {}]  }
   0x1   :  { %v14_v0 = vld [vmem:[%s118_s0] sm:$0xff]  ;;  %v15_v1 = vld [vmem:[%s118_s0 + $0x8] sm:$0xff] }
   0x2   :  { %v17_v2 = vsel %vm16_vm0, %v14_v0, 0.0  ;;  %v20_v3 = vsel %vm16_vm0, %v15_v1, 0.0  ;;  %v68_v21 = vld [vmem:[%s119_s1] ss:$0 sm:$0xff] }
   0x3   :  { %18 = vadd.xlane.f32.xlu0 %v17_v2  ;;  %v69_v23 = vld [vmem:[%s120_s2] ss:$0 sm:$0xff] }
   0x7   :  { %21 = vadd.xlane.f32.xlu0 %v20_v3 }
  0x8c   :  { %v19_v4 = vpop.xlane.xlu0 %18 }
  0x8d   :  { %v24_v5 = vmul.f32 0.03125, %v19_v4 }
  0x8f   :  { %v26_v6 = vsub.f32 %v14_v0, %v24_v5 }
  0x90   :  { %v22_v7 = vpop.xlane.xlu0 %21 }
  0x91   :  { %v25_v8 = vmul.f32 0.03125, %v22_v7  ;;  %v28_v9 = vmul.f32 %v26_v6, %v26_v6 }
  0x93   :  { %v27_v10 = vsub.f32 %v15_v1, %v25_v8  ;;  %v30_v11 = vsel %vm16_vm0, %v28_v9, 0.0 }
  0x94   :  { %31 = vadd.xlane.f32.xlu1 %v30_v11 }
  0x95   :  { %v29_v12 = vmul.f32 %v27_v10, %v27_v10 }
  0x97   :  { %v33_v13 = vsel %vm16_vm0, %v29_v12, 0.0 }
  0x98   :  { %34 = vadd.xlane.f32.xlu1 %v33_v13 }
 0x11d   :  { %v32_v14 = vpop.xlane.xlu1 %31 }
 0x11e   :  { %v36_v15 = vmul.f32 0.03125, %v32_v14 }
 0x120   :  { %v38_v16 = vadd.f32 1e-05, %v36_v15 }
 0x121   :  { %v35_v17 = vpop.xlane.xlu1 %34 }
 0x122   :  { %70 = vrsqrt.f32 %v38_v16  ;;  %v37_v18 = vmul.f32 0.03125, %v35_v17 }
 0x124   :  { %v39_v19 = vadd.f32 1e-05, %v37_v18 }
 0x126   :  { %72 = vrsqrt.f32 %v39_v19 }
 0x12f   :  { %v71_v20 = vpop.eup %70 }
 0x130   :  { %v42_v22 = vmul.f32 %v71_v20, %v26_v6 }
 0x132   :  { %v51_v24 = vmul.f32 %v68_v21, %v42_v22 }
 0x133   :  { %v73_v25 = vpop.eup %72 }
 0x134   :  { %v60_v26 = vadd.f32 %v69_v23, %v51_v24  ;;  %v43_v27 = vmul.f32 %v73_v25, %v27_v10 }
 0x136   :  { %62 = vst.msk [vmem:[%s121_s3] sm:$0xff] %vm16_vm0, %v60_v26  ;;  %v52_v28 = vmul.f32 %v68_v21, %v43_v27 }
 0x138   :  { %v61_v29 = vadd.f32 %v69_v23, %v52_v28 }
 0x13a   :  { %63 = vst.msk [vmem:[%s121_s3 + $0x8] sm:$0xff] %vm16_vm0, %v61_v29 }

// kernel: transformer_forward.53
= control target key start
LH: loop header
LB: loop body
LE: loop exit
PB: predicated region body
PF: predicated region fallthrough
CT: control target
= control target key end

     0   :  { %v87_v0 = vmov 0.0   ;;  %vm88_vm0 = vmmov 0   ;;  %vm21_vm1 = vcmask 261120   ;;  %vm66_vm2 = vcmask 785408   ;;  %s128_s1 = inlined_call_operand.vmem [shape: f32[32,96], index: 1, kind: input, shape index: {}]   ;;  %s129_s0 = inlined_call_operand.vmem [shape: f32[16,32], index: 0, kind: input, shape index: {}]   ;;  %s130_s2 = inlined_call_operand.vmem [shape: f32[16,96], index: 2, kind: output, shape index: {}]  }
   0x1   :  { %77 = vmatprep.subr.bf16.mxu0 %v87_v0  ;;  %v17_v1 = vld [vmem:[%s128_s1 + $0x10] sm:$0xff]  ;;  %v18_v2 = vld [vmem:[%s128_s1 + $0x18] sm:$0xff]  ;;  %v15_v3 = vld [vmem:[%s128_s1] sm:$0xff]  ;;  %81 = vmatprep.mubr.msk.bf16.mxu0 %vm88_vm0, %v87_v0 }
   0x2   :  { %v20_v4 = vpack.c.bf16 %v18_v2, %v17_v1  ;;  %v16_v5 = vld [vmem:[%s128_s1 + $0x8] sm:$0xff]  ;;  %v12_v7 = vld [vmem:[%s129_s0] sm:$0xff] }
   0x3   :  { %v19_v6 = vpack.c.bf16 %v16_v5, %v15_v3  ;;  %v13_v8 = vld [vmem:[%s129_s0 + $0x8] sm:$0xff] }
   0x4   :  { %78 = vmatpush3.bf16.msra.mxu0 %v20_v4  ;;  %v14_v9 = vpack.c.bf16 %v13_v8, %v12_v7 }
   0x5   :  { %79 = vmatprep.subr.bf16.mxu0 %v87_v0 }
   0x8   :  { %80 = vmatpush3.bf16.msra.mxu0 %v19_v6 }
   0xb   :  { %82 = vmatmul.mubr.msk.bf16.vlgmr.msra.gmra.mxu0 %vm21_vm1, %v14_v9 }
  0xcb   :  { %v59_v10 = vpop.f32.mrf.mxu0 }
  0xcc   :  { %67 = vst.msk [vmem:[%s130_s2] sm:$0xff] %vm66_vm2, %v59_v10 }
  0xcd   :  { %v83_v11 = vpop.f32.mrf.mxu0 }
  0xcf   :  { %v62_v12 = vpop.f32.mrf.mxu0 }
  0xd0   :  { %68 = vst.msk [vmem:[%s130_s2 + $0x8] sm:$0xff] %vm66_vm2, %v62_v12 }
  0xd1   :  { %v84_v13 = vpop.f32.mrf.mxu0 }

// kernel: transformer_forward.55
= control target key start
LH: loop header
LB: loop body
LE: loop exit
PB: predicated region body
PF: predicated region fallthrough
CT: control target
= control target key end

     0   :  { %v104_v0 = vmov 0.0   ;;  %vm105_vm0 = vmmov 0   ;;  %vm34_vm1 = vcmask 261120   ;;  %s167_s1 = inlined_call_operand.vmem [shape: f32[32,32], index: 1, kind: input, shape index: {}]   ;;  %s168_s0 = inlined_call_operand.vmem [shape: f32[16,32], index: 0, kind: input, shape index: {}]   ;;  %s169_s2 = inlined_call_operand.vmem [shape: f32[1,32], index: 2, kind: input, shape index: {}]   ;;  %s170_s3 = inlined_call_operand.vmem [shape: f32[16,32], index: 3, kind: input, shape index: {}]   ;;  %s171_s4 = inlined_call_operand.vmem [shape: f32[16,32], index: 4, kind: output, shape index: {}]  }
   0x1   :  { %94 = vmatprep.subr.bf16.mxu0 %v104_v0  ;;  %v23_v1 = vld [vmem:[%s167_s1 + $0x10] sm:$0xff]  ;;  %v24_v2 = vld [vmem:[%s167_s1 + $0x18] sm:$0xff]  ;;  %v21_v3 = vld [vmem:[%s167_s1] sm:$0xff]  ;;  %98 = vmatprep.mubr.msk.bf16.mxu0 %vm105_vm0, %v104_v0 }
   0x2   :  { %v26_v4 = vpack.c.bf16 %v24_v2, %v23_v1  ;;  %v22_v5 = vld [vmem:[%s167_s1 + $0x8] sm:$0xff]  ;;  %v18_v7 = vld [vmem:[%s168_s0] sm:$0xff] }
   0x3   :  { %v25_v6 = vpack.c.bf16 %v22_v5, %v21_v3  ;;  %v19_v8 = vld [vmem:[%s168_s0 + $0x8] sm:$0xff]  ;;  %v89_v10 = vld [vmem:[%s169_s2] ss:$0 sm:$0xff] }
   0x4   :  { %95 = vmatpush3.bf16.msra.mxu0 %v26_v4  ;;  %v20_v9 = vpack.c.bf16 %v19_v8, %v18_v7  ;;  %v79_v12 = vld [vmem:[%s170_s3] sm:$0xff]  ;;  %v80_v17 = vld [vmem:[%s170_s3 + $0x8] sm:$0xff] }
   0x5   :  { %96 = vmatprep.subr.bf16.mxu0 %v104_v0 }
   0x8   :  { %97 = vmatpush3.bf16.msra.mxu0 %v25_v6 }
   0xb   :  { %99 = vmatmul.mubr.msk.bf16.vlgmr.msra.gmra.mxu0 %vm34_vm1, %v20_v9 }
  0xcb   :  { %v72_v11 = vpop.f32.mrf.mxu0 }
  0xcc   :  { %v73_v13 = vadd.f32 %v89_v10, %v72_v11 }
  0xcd   :  { %v100_v14 = vpop.f32.mrf.mxu0 }
  0xce   :  { %v81_v15 = vadd.f32 %v79_v12, %v73_v13 }
  0xcf   :  { %v75_v16 = vpop.f32.mrf.mxu0 }
  0xd0   :  { %83 = vst.msk [vmem:[%s171_s4] sm:$0xff] %vm34_vm1, %v81_v15  ;;  %v76_v18 = vadd.f32 %v89_v10, %v75_v16 }
  0xd1   :  { %v101_v19 = vpop.f32.mrf.mxu0 }
  0xd2   :  { %v82_v20 = vadd.f32 %v80_v17, %v76_v18 }
  0xd4   :  { %84 = vst.msk [vmem:[%s171_s4 + $0x8] sm:$0xff] %vm34_vm1, %v82_v20 }

// kernel: transformer_forward.54
= control target key start
LH: loop header
LB: loop body
LE: loop exit
PB: predicated region body
PF: predicated region fallthrough
CT: control target
= control target key end

     0   :  { %s651_s12 = smov 0   ;;  %s653_s13 = smov 0   ;;  %s708_s0 = inlined_call_operand.vmem [shape: f32[8,8,8], index: 0, kind: input, shape index: {}]   ;;  %s709_s1 = inlined_call_operand.vmem [shape: f32[8,8,8], index: 1, kind: input, shape index: {}]   ;;  %s710_s2 = inlined_call_operand.vmem [shape: f32[8,8,8], index: 2, kind: input, shape index: {}]   ;;  %s711_s3 = inlined_call_operand.vmem [shape: f32[8,8,8], index: 3, kind: output, shape index: {}]  }
   0x1   :  { %s655_s14 = smov 0  }
   0x2 LB: > { %s32_s15 = sadd.s32 1, %s621_s13  ;;  %p542_p0 = scmp.ge.s32.totalorder %s625_s14, 1  ;;  %s625_s14 = sphi %s655_s14, %s13_s14   ;;  %s621_s13 = sphi %s653_s13, %s713_s13   ;;  %s617_s12 = sphi %s651_s12, %s712_s12  }
   0x3   : > { %p34_p1 = scmp.ge.s32.totalorder %s32_s15, 8  ;;  %p190_p2 = scmp.lt.s32.totalorder %s625_s14, 9 }
   0x5   : > { %s715_s15 = smov (%p34_p1, %s32_s15), 0  ;;  %p191_p3 = pnand %p542_p0, %p190_p2 }
   0x6   : > { %p232_p4 = scmp.lt.s32.totalorder (!%p191_p3), %s617_s12, 7 }
   0x7   : > { %194 = sbr.rel (%p191_p3) target bundleno = 795 (0x31b), region = 32 }
   0xc   : > { %vm268_vm0 = vcmask 64512   ;;  %v627_v0 = vmov 0.0   ;;  %vm628_vm1 = vmmov 0   ;;  %s717_s12 = smov (!%p232_p4, %s617_s12), 7  ;;  %vm265_vm2 = vcmask 7168  }
   0xd   : > { %555 = vmatprep.subr.bf16.mxu0 %v627_v0  ;;  %269 = vst.msk [vmem:[#allocation4] sm:$0xff] %vm268_vm0, %v627_v0  ;;  %557 = vmatprep.mubr.msk.bf16.mxu0 %vm628_vm1, %v627_v0  ;;  %s670_s16 = sshll.u32 %s717_s12, 3  ;;  %v629_v6 = vmov -inf   ;;  %v323_v7 = vlaneseq  ;;  %v630_v17 = vmov 0   ;;  %vm364_vm4 = vcmask 1043456  }
   0xe   : > { %561 = vmatprep.subr.bf16.mxu1 %v627_v0  ;;  %563 = vmatprep.mubr.msk.bf16.mxu1 %vm628_vm1, %v627_v0  ;;  %s245_s19 = scalar_lea.vmem %s709_s1, %s670_s16  ;;  %s238_s22 = scalar_lea.vmem %s708_s0, %s670_s16  ;;  %266 = vst.msk [vmem:[#allocation2] sm:$0xff] %vm265_vm2, %v629_v6  ;;  %267 = vst.msk [vmem:[#allocation3] sm:$0xff] %vm265_vm2, %v627_v0 }
   0xf   : > { %v272_v1 = vld [vmem:[%s245_s19] sm:$0xff]  ;;  %v324_v8 = vshrl.u32 %v323_v7, 7  ;;  %v329_v9 = vand.u32 127, %v323_v7  ;;  %595 = vset.pattern.permute.xlu0 %v630_v17  ;;  %596 = vset.pattern.permute.xlu1 %v630_v17  ;;  %s252_s25 = scalar_lea.vmem %s710_s2, %s670_s16  ;;  %s259_s28 = scalar_lea.vmem %s711_s3, %s670_s16 }
  0x10   : > { %v273_v2 = vpack.c.bf16 %v272_v1, %v272_v1  ;;  %v270_v4 = vld [vmem:[%s238_s22] sm:$0xff] }
  0x11   : > { %v271_v5 = vpack.c.bf16 %v270_v4, %v270_v4  ;;  %vm332_vm3 = vcmp.ge.s32.totalorder %v324_v8, %v329_v9  ;;  %v359_v22 = vld [vmem:[%s252_s25] sm:$0xff] }
  0x12   : > { %v279_v3 = vsel %vm268_vm0, %v273_v2, 0  ;;  %v360_v23 = vpack.c.bf16 %v359_v22, %v359_v22 }
  0x13   : > { %556 = vmatpush3.bf16.xpose.msra.mxu0 %v279_v3 }
  0x14   : > { %v366_v24 = vsel %vm364_vm4, %v360_v23, 0  ;;  %v408_v39 = vld [vmem:[#allocation4] sm:$0xff] }
  0x15   : > { %v334_v18 = vld [vmem:[#allocation2] sm:$0xff]  ;;  %562 = vmatpush3.bf16.msra.mxu1 %v366_v24  ;;  %v350_v33 = vld [vmem:[#allocation3] sm:$0xff] }
  0x1a   : > { %558 = vmatmul.mubr.msk.bf16.vlgmr.msra.gmra.mxu0 %vm268_vm0, %v271_v5 }
  0xda   : > { %v315_v10 = vpop.f32.mrf.mxu0 }
  0xdb   : > { %v321_v11 = vmul.f32 0.35355338, %v315_v10 }
  0xdc   : > { %v559_v12 = vpop.f32.mrf.mxu0 }
  0xdd   : > { %v333_v13 = vsel %vm332_vm3, %v321_v11, -1e+30 }
  0xde   : > { %v318_v14 = vpop.f32.mrf.mxu0  ;;  %v335_v15 = vsel %vm268_vm0, %v333_v13, -inf }
  0xdf   : > { %336 = vmax.xlane.f32.xlu0 %v335_v15 }
  0xe0   : > { %v560_v16 = vpop.f32.mrf.mxu0 }
 0x168   : > { %v337_v19 = vpop.xlane.xlu0 %336 }
 0x169   : > { %v338_v20 = vmax.f32 %v334_v18, %v337_v19 }
 0x16b   : > { %v339_v21 = vsub.f32 %v334_v18, %v338_v20  ;;  %417 = vst.msk [vmem:[#allocation2] sm:$0xff] %vm265_vm2, %v338_v20  ;;  %344 = vperm.xlu0 %595, %v338_v20  }
 0x16d   : > { %v340_v29 = vmul.f32 1.442695, %v339_v21 }
 0x1e6   : > { %v345_v25 = vpop.permute.xlu0 %344 }
 0x1e7   : > { %v347_v26 = vsub.f32 %v333_v13, %v345_v25 }
 0x1e9   : > { %v348_v27 = vmul.f32 1.442695, %v347_v26 }
 0x1eb   : > { %597 = vpow2.f32 %v348_v27 }
 0x1ec   : > { %599 = vpow2.f32 %v340_v29 }
 0x1f8   : > { %v598_v28 = vpop.eup %597 }
 0x1f9   : > { %v352_v30 = vsel %vm268_vm0, %v598_v28, 0.0  ;;  %v358_v31 = vpack.c.bf16 %v598_v28, %v598_v28  ;;  %v600_v32 = vpop.eup %599 }
 0x1fa   : > { %353 = vadd.xlane.f32.xlu1 %v352_v30  ;;  %v351_v34 = vmul.f32 %v600_v32, %v350_v33 }
 0x1fb   : > { %564 = vmatmul.mubr.msk.bf16.vlgmr.msra.gmra.mxu1 %vm268_vm0, %v358_v31 }
 0x20b   : > { %411 = vperm.xlu1 %596, %v600_v32  }
 0x283   : > { %v354_v35 = vpop.xlane.xlu1 %353 }
 0x284   : > { %v355_v36 = vadd.f32 %v354_v35, %v351_v34 }
 0x286   : > { %357 = vst.msk [vmem:[#allocation3] sm:$0xff] %vm265_vm2, %v355_v36 }
 0x287   : > { %v412_v40 = vpop.permute.xlu1 %411 }
 0x288   : > { %v414_v41 = vmul.f32 %v412_v40, %v408_v39 }
 0x28d   : > { %v421_v37 = vld [vmem:[#allocation3] sm:$0xff] }
 0x28e   : > { %601 = vrcp.f32 %v421_v37 }
 0x29b   : > { %v602_v38 = vpop.eup %601 }
 0x29c   : > { %426 = vperm.xlu1 %596, %v602_v38  }
 0x2bb   : > { %v402_v42 = vpop.f32.mrf.mxu1 }
 0x2bc   : > { %v415_v43 = vadd.f32 %v414_v41, %v402_v42 }
 0x2bd   : > { %v565_v44 = vpop.f32.mrf.mxu1 }
 0x2be   : > { %416 = vst.msk [vmem:[#allocation4] sm:$0xff] %vm268_vm0, %v415_v43 }
 0x2bf   : > { %v405_v45 = vpop.f32.mrf.mxu1 }
 0x2c1   : > { %v566_v46 = vpop.f32.mrf.mxu1 }
 0x2c5   : > { %v423_v47 = vld [vmem:[#allocation4] sm:$0xff] }
 0x317   : > { %v427_v48 = vpop.permute.xlu1 %426 }
 0x318   : > { %v429_v49 = vmul.f32 %v427_v48, %v423_v47 }
 0x31a   : > { %430 = vst.msk [vmem:[%s259_s28] sm:$0xff] %vm268_vm0, %v429_v49 }
 0x31b PF: > { %s13_s14 = sadd.s32 1, %s625_s14   ;;  %s712_s12 = smov %s621_s13 }
 0x31c   : > { %p10_p5 = scmp.ge.s32.totalorder %s13_s14, 10   ;;  %s713_s13 = smov %s715_s15 }
 0x31e   :  { %12 = sbr.rel (!%p10_p5) target bundleno = 2 (0x2), region = 76 }

// kernel: transformer_forward.57
= control target key start
LH: loop header
LB: loop body
LE: loop exit
PB: predicated region body
PF: predicated region fallthrough
CT: control target
= control target key end

     0   :  { %v86_v0 = vmov 0.0   ;;  %vm87_vm0 = vmmov 0   ;;  %vm21_vm1 = vcmask 261120   ;;  %s127_s1 = inlined_call_operand.vmem [shape: f32[32,32], index: 1, kind: input, shape index: {}]   ;;  %s128_s0 = inlined_call_operand.vmem [shape: f32[16,32], index: 0, kind: input, shape index: {}]   ;;  %s129_s2 = inlined_call_operand.vmem [shape: f32[16,32], index: 2, kind: output, shape index: {}]  }
   0x1   :  { %76 = vmatprep.subr.bf16.mxu0 %v86_v0  ;;  %v17_v1 = vld [vmem:[%s127_s1 + $0x10] sm:$0xff]  ;;  %v18_v2 = vld [vmem:[%s127_s1 + $0x18] sm:$0xff]  ;;  %v15_v3 = vld [vmem:[%s127_s1] sm:$0xff]  ;;  %80 = vmatprep.mubr.msk.bf16.mxu0 %vm87_vm0, %v86_v0 }
   0x2   :  { %v20_v4 = vpack.c.bf16 %v18_v2, %v17_v1  ;;  %v16_v5 = vld [vmem:[%s127_s1 + $0x8] sm:$0xff]  ;;  %v12_v7 = vld [vmem:[%s128_s0] sm:$0xff] }
   0x3   :  { %v19_v6 = vpack.c.bf16 %v16_v5, %v15_v3  ;;  %v13_v8 = vld [vmem:[%s128_s0 + $0x8] sm:$0xff] }
   0x4   :  { %77 = vmatpush3.bf16.msra.mxu0 %v20_v4  ;;  %v14_v9 = vpack.c.bf16 %v13_v8, %v12_v7 }
   0x5   :  { %78 = vmatprep.subr.bf16.mxu0 %v86_v0 }
   0x8   :  { %79 = vmatpush3.bf16.msra.mxu0 %v19_v6 }
   0xb   :  { %81 = vmatmul.mubr.msk.bf16.vlgmr.msra.gmra.mxu0 %vm21_vm1, %v14_v9 }
  0xcb   :  { %v59_v10 = vpop.f32.mrf.mxu0 }
  0xcc   :  { %66 = vst.msk [vmem:[%s129_s2] sm:$0xff] %vm21_vm1, %v59_v10 }
  0xcd   :  { %v82_v11 = vpop.f32.mrf.mxu0 }
  0xcf   :  { %v62_v12 = vpop.f32.mrf.mxu0 }
  0xd0   :  { %67 = vst.msk [vmem:[%s129_s2 + $0x8] sm:$0xff] %vm21_vm1, %v62_v12 }
  0xd1   :  { %v83_v13 = vpop.f32.mrf.mxu0 }

// kernel: transformer_forward.39
= control target key start
LH: loop header
LB: loop body
LE: loop exit
PB: predicated region body
PF: predicated region fallthrough
CT: control target
= control target key end

     0   :  { %s639_s12 = smov 0   ;;  %s641_s13 = smov 0   ;;  %s696_s0 = inlined_call_operand.vmem [shape: f32[8,8,8], index: 0, kind: input, shape index: {}]   ;;  %s697_s1 = inlined_call_operand.vmem [shape: f32[8,8,8], index: 1, kind: input, shape index: {}]   ;;  %s698_s2 = inlined_call_operand.vmem [shape: f32[8,8,8], index: 2, kind: input, shape index: {}]   ;;  %s699_s3 = inlined_call_operand.vmem [shape: f32[8,8,8], index: 3, kind: output, shape index: {}]  }
   0x1   :  { %s643_s14 = smov 0  }
   0x2 LB: > { %s32_s15 = sadd.s32 1, %s609_s13  ;;  %p530_p0 = scmp.ge.s32.totalorder %s613_s14, 1  ;;  %s613_s14 = sphi %s643_s14, %s13_s14   ;;  %s609_s13 = sphi %s641_s13, %s701_s13   ;;  %s605_s12 = sphi %s639_s12, %s700_s12  }
   0x3   : > { %p34_p1 = scmp.ge.s32.totalorder %s32_s15, 8  ;;  %p190_p2 = scmp.lt.s32.totalorder %s613_s14, 9 }
   0x5   : > { %s703_s15 = smov (%p34_p1, %s32_s15), 0  ;;  %p191_p3 = pnand %p530_p0, %p190_p2 }
   0x6   : > { %p232_p4 = scmp.lt.s32.totalorder (!%p191_p3), %s605_s12, 7 }
   0x7   : > { %194 = sbr.rel (%p191_p3) target bundleno = 794 (0x31a), region = 32 }
   0xc   : > { %vm268_vm0 = vcmask 64512   ;;  %v615_v0 = vmov 0.0   ;;  %vm616_vm1 = vmmov 0   ;;  %s705_s12 = smov (!%p232_p4, %s605_s12), 7  ;;  %vm265_vm2 = vcmask 7168  }
   0xd   : > { %543 = vmatprep.subr.bf16.mxu0 %v615_v0  ;;  %269 = vst.msk [vmem:[#allocation4] sm:$0xff] %vm268_vm0, %v615_v0  ;;  %545 = vmatprep.mubr.msk.bf16.mxu0 %vm616_vm1, %v615_v0  ;;  %s658_s16 = sshll.u32 %s705_s12, 3  ;;  %v617_v6 = vmov -inf   ;;  %v618_v13 = vmov 0   ;;  %vm352_vm3 = vcmask 1043456  }
   0xe   : > { %549 = vmatprep.subr.bf16.mxu1 %v615_v0  ;;  %551 = vmatprep.mubr.msk.bf16.mxu1 %vm616_vm1, %v615_v0  ;;  %s245_s19 = scalar_lea.vmem %s697_s1, %s658_s16  ;;  %s238_s22 = scalar_lea.vmem %s696_s0, %s658_s16  ;;  %266 = vst.msk [vmem:[#allocation2] sm:$0xff] %vm265_vm2, %v617_v6  ;;  %267 = vst.msk [vmem:[#allocation3] sm:$0xff] %vm265_vm2, %v615_v0 }
   0xf   : > { %v272_v1 = vld [vmem:[%s245_s19] sm:$0xff]  ;;  %583 = vset.pattern.permute.xlu0 %v618_v13  ;;  %584 = vset.pattern.permute.xlu1 %v618_v13  ;;  %s252_s25 = scalar_lea.vmem %s698_s2, %s658_s16  ;;  %s259_s28 = scalar_lea.vmem %s699_s3, %s658_s16 }
  0x10   : > { %v273_v2 = vpack.c.bf16 %v272_v1, %v272_v1  ;;  %v270_v4 = vld [vmem:[%s238_s22] sm:$0xff] }
  0x11   : > { %v271_v5 = vpack.c.bf16 %v270_v4, %v270_v4  ;;  %v347_v18 = vld [vmem:[%s252_s25] sm:$0xff] }
  0x12   : > { %v279_v3 = vsel %vm268_vm0, %v273_v2, 0  ;;  %v348_v19 = vpack.c.bf16 %v347_v18, %v347_v18 }
  0x13   : > { %544 = vmatpush3.bf16.xpose.msra.mxu0 %v279_v3 }
  0x14   : > { %v354_v20 = vsel %vm352_vm3, %v348_v19, 0  ;;  %v396_v35 = vld [vmem:[#allocation4] sm:$0xff] }
  0x15   : > { %v322_v14 = vld [vmem:[#allocation2] sm:$0xff]  ;;  %550 = vmatpush3.bf16.msra.mxu1 %v354_v20  ;;  %v338_v29 = vld [vmem:[#allocation3] sm:$0xff] }
  0x1a   : > { %546 = vmatmul.mubr.msk.bf16.vlgmr.msra.gmra.mxu0 %vm268_vm0, %v271_v5 }
  0xda   : > { %v315_v7 = vpop.f32.mrf.mxu0 }
  0xdb   : > { %v321_v8 = vmul.f32 0.35355338, %v315_v7 }
  0xdc   : > { %v547_v9 = vpop.f32.mrf.mxu0 }
  0xdd   : > { %v323_v10 = vsel %vm268_vm0, %v321_v8, -inf }
  0xde   : > { %324 = vmax.xlane.f32.xlu0 %v323_v10  ;;  %v318_v11 = vpop.f32.mrf.mxu0 }
  0xe0   : > { %v548_v12 = vpop.f32.mrf.mxu0 }
 0x167   : > { %v325_v15 = vpop.xlane.xlu0 %324 }
 0x168   : > { %v326_v16 = vmax.f32 %v322_v14, %v325_v15 }
 0x16a   : > { %v327_v17 = vsub.f32 %v322_v14, %v326_v16  ;;  %405 = vst.msk [vmem:[#allocation2] sm:$0xff] %vm265_vm2, %v326_v16  ;;  %332 = vperm.xlu0 %583, %v326_v16  }
 0x16c   : > { %v328_v25 = vmul.f32 1.442695, %v327_v17 }
 0x1e5   : > { %v333_v21 = vpop.permute.xlu0 %332 }
 0x1e6   : > { %v335_v22 = vsub.f32 %v321_v8, %v333_v21 }
 0x1e8   : > { %v336_v23 = vmul.f32 1.442695, %v335_v22 }
 0x1ea   : > { %585 = vpow2.f32 %v336_v23 }
 0x1eb   : > { %587 = vpow2.f32 %v328_v25 }
 0x1f7   : > { %v586_v24 = vpop.eup %585 }
 0x1f8   : > { %v340_v26 = vsel %vm268_vm0, %v586_v24, 0.0  ;;  %v346_v27 = vpack.c.bf16 %v586_v24, %v586_v24  ;;  %v588_v28 = vpop.eup %587 }
 0x1f9   : > { %341 = vadd.xlane.f32.xlu1 %v340_v26  ;;  %v339_v30 = vmul.f32 %v588_v28, %v338_v29 }
 0x1fa   : > { %552 = vmatmul.mubr.msk.bf16.vlgmr.msra.gmra.mxu1 %vm268_vm0, %v346_v27 }
 0x20a   : > { %399 = vperm.xlu1 %584, %v588_v28  }
 0x282   : > { %v342_v31 = vpop.xlane.xlu1 %341 }
 0x283   : > { %v343_v32 = vadd.f32 %v342_v31, %v339_v30 }
 0x285   : > { %345 = vst.msk [vmem:[#allocation3] sm:$0xff] %vm265_vm2, %v343_v32 }
 0x286   : > { %v400_v36 = vpop.permute.xlu1 %399 }
 0x287   : > { %v402_v37 = vmul.f32 %v400_v36, %v396_v35 }
 0x28c   : > { %v409_v33 = vld [vmem:[#allocation3] sm:$0xff] }
 0x28d   : > { %589 = vrcp.f32 %v409_v33 }
 0x29a   : > { %v590_v34 = vpop.eup %589 }
 0x29b   : > { %414 = vperm.xlu1 %584, %v590_v34  }
 0x2ba   : > { %v390_v38 = vpop.f32.mrf.mxu1 }
 0x2bb   : > { %v403_v39 = vadd.f32 %v402_v37, %v390_v38 }
 0x2bc   : > { %v553_v40 = vpop.f32.mrf.mxu1 }
 0x2bd   : > { %404 = vst.msk [vmem:[#allocation4] sm:$0xff] %vm268_vm0, %v403_v39 }
 0x2be   : > { %v393_v41 = vpop.f32.mrf.mxu1 }
 0x2c0   : > { %v554_v42 = vpop.f32.mrf.mxu1 }
 0x2c4   : > { %v411_v43 = vld [vmem:[#allocation4] sm:$0xff] }
 0x316   : > { %v415_v44 = vpop.permute.xlu1 %414 }
 0x317   : > { %v417_v45 = vmul.f32 %v415_v44, %v411_v43 }
 0x319   : > { %418 = vst.msk [vmem:[%s259_s28] sm:$0xff] %vm268_vm0, %v417_v45 }
 0x31a PF: > { %s13_s14 = sadd.s32 1, %s613_s14   ;;  %s700_s12 = smov %s609_s13 }
 0x31b   : > { %p10_p5 = scmp.ge.s32.totalorder %s13_s14, 10   ;;  %s701_s13 = smov %s703_s15 }
 0x31d   :  { %12 = sbr.rel (!%p10_p5) target bundleno = 2 (0x2), region = 76 }

// kernel: transformer_forward.42
= control target key start
LH: loop header
LB: loop body
LE: loop exit
PB: predicated region body
PF: predicated region fallthrough
CT: control target
= control target key end

     0   :  { %v112_v0 = vmov 0.0   ;;  %vm113_vm0 = vmmov 0   ;;  %vm31_vm1 = vcmask 261120   ;;  %vm86_vm2 = vcmask 523264   ;;  %s161_s1 = inlined_call_operand.vmem [shape: f32[32,64], index: 1, kind: input, shape index: {}]   ;;  %s162_s0 = inlined_call_operand.vmem [shape: f32[16,32], index: 0, kind: input, shape index: {}]   ;;  %s163_s2 = inlined_call_operand.vmem [shape: f32[1,64], index: 2, kind: input, shape index: {}]   ;;  %s164_s3 = inlined_call_operand.vmem [shape: f32[16,64], index: 3, kind: output, shape index: {}]  }
   0x1   :  { %98 = vmatprep.subr.bf16.mxu0 %v112_v0  ;;  %v20_v1 = vld [vmem:[%s161_s1 + $0x10] sm:$0xff]  ;;  %v21_v2 = vld [vmem:[%s161_s1 + $0x18] sm:$0xff]  ;;  %v18_v3 = vld [vmem:[%s161_s1] sm:$0xff]  ;;  %102 = vmatprep.mubr.msk.bf16.mxu0 %vm113_vm0, %v112_v0 }
   0x2   :  { %v23_v4 = vpack.c.bf16 %v21_v2, %v20_v1  ;;  %v19_v5 = vld [vmem:[%s161_s1 + $0x8] sm:$0xff]  ;;  %v15_v7 = vld [vmem:[%s162_s0] sm:$0xff] }
   0x3   :  { %v22_v6 = vpack.c.bf16 %v19_v5, %v18_v3  ;;  %v16_v8 = vld [vmem:[%s162_s0 + $0x8] sm:$0xff]  ;;  %v93_v10 = vld [vmem:[%s163_s2] ss:$0 sm:$0xff] }
   0x4   :  { %99 = vmatpush3.bf16.msra.mxu0 %v23_v4  ;;  %v17_v9 = vpack.c.bf16 %v16_v8, %v15_v7 }
   0x5   :  { %100 = vmatprep.subr.bf16.mxu0 %v112_v0 }
   0x8   :  { %101 = vmatpush3.bf16.msra.mxu0 %v22_v6 }
   0xb   :  { %103 = vmatmul.mubr.msk.bf16.vlgmr.msra.gmra.mxu0 %vm31_vm1, %v17_v9 }
  0xcb   :  { %v69_v11 = vpop.f32.mrf.mxu0 }
  0xcc   :  { %v70_v12 = vadd.f32 %v93_v10, %v69_v11 }
  0xcd   :  { %v104_v13 = vpop.f32.mrf.mxu0 }
  0xce   :  { %v78_v14 = vmul.f32 0.70710677, %v70_v12  ;;  %v76_v20 = vmul.f32 0.5, %v70_v12 }
  0xcf   :  { %v72_v15 = vpop.f32.mrf.mxu0 }
  0xd0   :  { %108 = verf.f32 %v78_v14  ;;  %v73_v16 = vadd.f32 %v93_v10, %v72_v15 }
  0xd1   :  { %v105_v17 = vpop.f32.mrf.mxu0 }
  0xd2   :  { %v79_v18 = vmul.f32 0.70710677, %v73_v16  ;;  %v77_v24 = vmul.f32 0.5, %v73_v16 }
  0xd4   :  { %110 = verf.f32 %v79_v18 }
  0xdd   :  { %v109_v19 = vpop.eup %108 }
  0xde   :  { %v82_v21 = vadd.f32 1.0, %v109_v19 }
  0xe0   :  { %v84_v22 = vmul.f32 %v82_v21, %v76_v20 }
  0xe1   :  { %v111_v23 = vpop.eup %110 }
  0xe2   :  { %87 = vst.msk [vmem:[%s164_s3] sm:$0xff] %vm86_vm2, %v84_v22  ;;  %v83_v25 = vadd.f32 1.0, %v111_v23 }
  0xe4   :  { %v85_v26 = vmul.f32 %v83_v25, %v77_v24 }
  0xe6   :  { %88 = vst.msk [vmem:[%s164_s3 + $0x8] sm:$0xff] %vm86_vm2, %v85_v26 }

// kernel: transformer_forward.43
= control target key start
LH: loop header
LB: loop body
LE: loop exit
PB: predicated region body
PF: predicated region fallthrough
CT: control target
= control target key end

     0   :  { %v117_v0 = vmov 0.0   ;;  %vm118_vm0 = vmmov 0   ;;  %vm40_vm1 = vcmask 523264   ;;  %vm89_vm2 = vcmask 261120   ;;  %s189_s1 = inlined_call_operand.vmem [shape: f32[64,32], index: 1, kind: input, shape index: {}]   ;;  %s190_s0 = inlined_call_operand.vmem [shape: f32[16,64], index: 0, kind: input, shape index: {}]   ;;  %s191_s2 = inlined_call_operand.vmem [shape: f32[1,32], index: 2, kind: input, shape index: {}]   ;;  %s192_s3 = inlined_call_operand.vmem [shape: f32[16,32], index: 3, kind: input, shape index: {}]   ;;  %s193_s4 = inlined_call_operand.vmem [shape: f32[16,32], index: 4, kind: output, shape index: {}]  }
   0x1   :  { %103 = vmatprep.subr.bf16.mxu0 %v117_v0  ;;  %v27_v1 = vld [vmem:[%s189_s1 + $0x30] sm:$0xff]  ;;  %v28_v2 = vld [vmem:[%s189_s1 + $0x38] sm:$0xff]  ;;  %v25_v3 = vld [vmem:[%s189_s1 + $0x20] sm:$0xff]  ;;  %111 = vmatprep.mubr.msk.bf16.mxu0 %vm118_vm0, %v117_v0 }
   0x2   :  { %v32_v4 = vpack.c.bf16 %v28_v2, %v27_v1  ;;  %v26_v5 = vld [vmem:[%s189_s1 + $0x28] sm:$0xff]  ;;  %v23_v7 = vld [vmem:[%s189_s1 + $0x10] sm:$0xff]  ;;  %v24_v8 = vld [vmem:[%s189_s1 + $0x18] sm:$0xff] }
   0x3   :  { %v31_v6 = vpack.c.bf16 %v26_v5, %v25_v3  ;;  %v30_v9 = vpack.c.bf16 %v24_v8, %v23_v7  ;;  %v21_v10 = vld [vmem:[%s189_s1] sm:$0xff]  ;;  %v22_v11 = vld [vmem:[%s189_s1 + $0x8] sm:$0xff] }
   0x4   :  { %104 = vmatpush3.bf16.msra.mxu0 %v32_v4  ;;  %v29_v12 = vpack.c.bf16 %v22_v11, %v21_v10  ;;  %v18_v13 = vld [vmem:[%s190_s0] sm:$0xff]  ;;  %v19_v14 = vld [vmem:[%s190_s0 + $0x8] sm:$0xff] }
   0x5   :  { %105 = vmatprep.subr.bf16.mxu0 %v117_v0  ;;  %v20_v15 = vpack.c.bf16 %v19_v14, %v18_v13  ;;  %v96_v16 = vld [vmem:[%s191_s2] ss:$0 sm:$0xff]  ;;  %v86_v23 = vld [vmem:[%s192_s3 + $0x8] sm:$0xff] }
   0x6   :  { %v85_v18 = vld [vmem:[%s192_s3] sm:$0xff] }
   0x8   :  { %106 = vmatpush3.bf16.msra.mxu0 %v31_v6 }
   0x9   :  { %107 = vmatprep.subr.bf16.mxu0 %v117_v0 }
   0xc   :  { %108 = vmatpush3.bf16.msra.mxu0 %v30_v9 }
   0xd   :  { %109 = vmatprep.subr.bf16.mxu0 %v117_v0 }
  0x10   :  { %110 = vmatpush3.bf16.msra.mxu0 %v29_v12 }
  0x13   :  { %112 = vmatmul.mubr.msk.bf16.vlgmr.msra.gmra.mxu0 %vm40_vm1, %v20_v15 }
  0xd3   :  { %v78_v17 = vpop.f32.mrf.mxu0 }
  0xd4   :  { %v79_v19 = vadd.f32 %v96_v16, %v78_v17 }
  0xd5   :  { %v113_v20 = vpop.f32.mrf.mxu0 }
  0xd6   :  { %v87_v21 = vadd.f32 %v85_v18, %v79_v19 }
  0xd7   :  { %v81_v22 = vpop.f32.mrf.mxu0 }
  0xd8   :  { %90 = vst.msk [vmem:[%s193_s4] sm:$0xff] %vm89_vm2, %v87_v21  ;;  %v82_v24 = vadd.f32 %v96_v16, %v81_v22 }
  0xd9   :  { %v114_v25 = vpop.f32.mrf.mxu0 }
  0xda   :  { %v88_v26 = vadd.f32 %v86_v23, %v82_v24 }
  0xdc   :  { %91 = vst.msk [vmem:[%s193_s4 + $0x8] sm:$0xff] %vm89_vm2, %v88_v26 }

// kernel: transformer_forward.58
= control target key start
LH: loop header
LB: loop body
LE: loop exit
PB: predicated region body
PF: predicated region fallthrough
CT: control target
= control target key end

     0   :  { %v87_v0 = vmov 0.0   ;;  %vm88_vm0 = vmmov 0   ;;  %vm21_vm1 = vcmask 261120   ;;  %vm66_vm2 = vcmask 523264   ;;  %s128_s1 = inlined_call_operand.vmem [shape: f32[32,64], index: 1, kind: input, shape index: {}]   ;;  %s129_s0 = inlined_call_operand.vmem [shape: f32[16,32], index: 0, kind: input, shape index: {}]   ;;  %s130_s2 = inlined_call_operand.vmem [shape: f32[16,64], index: 2, kind: output, shape index: {}]  }
   0x1   :  { %77 = vmatprep.subr.bf16.mxu0 %v87_v0  ;;  %v17_v1 = vld [vmem:[%s128_s1 + $0x10] sm:$0xff]  ;;  %v18_v2 = vld [vmem:[%s128_s1 + $0x18] sm:$0xff]  ;;  %v15_v3 = vld [vmem:[%s128_s1] sm:$0xff]  ;;  %81 = vmatprep.mubr.msk.bf16.mxu0 %vm88_vm0, %v87_v0 }
   0x2   :  { %v20_v4 = vpack.c.bf16 %v18_v2, %v17_v1  ;;  %v16_v5 = vld [vmem:[%s128_s1 + $0x8] sm:$0xff]  ;;  %v12_v7 = vld [vmem:[%s129_s0] sm:$0xff] }
   0x3   :  { %v19_v6 = vpack.c.bf16 %v16_v5, %v15_v3  ;;  %v13_v8 = vld [vmem:[%s129_s0 + $0x8] sm:$0xff] }
   0x4   :  { %78 = vmatpush3.bf16.msra.mxu0 %v20_v4  ;;  %v14_v9 = vpack.c.bf16 %v13_v8, %v12_v7 }
   0x5   :  { %79 = vmatprep.subr.bf16.mxu0 %v87_v0 }
   0x8   :  { %80 = vmatpush3.bf16.msra.mxu0 %v19_v6 }
   0xb   :  { %82 = vmatmul.mubr.msk.bf16.vlgmr.msra.gmra.mxu0 %vm21_vm1, %v14_v9 }
  0xcb   :  { %v59_v10 = vpop.f32.mrf.mxu0 }
  0xcc   :  { %67 = vst.msk [vmem:[%s130_s2] sm:$0xff] %vm66_vm2, %v59_v10 }
  0xcd   :  { %v83_v11 = vpop.f32.mrf.mxu0 }
  0xcf   :  { %v62_v12 = vpop.f32.mrf.mxu0 }
  0xd0   :  { %68 = vst.msk [vmem:[%s130_s2 + $0x8] sm:$0xff] %vm66_vm2, %v62_v12 }
  0xd1   :  { %v84_v13 = vpop.f32.mrf.mxu0 }

// kernel: transformer_forward.75
= control target key start
LH: loop header
LB: loop body
LE: loop exit
PB: predicated region body
PF: predicated region fallthrough
CT: control target
= control target key end

     0   :  { %v155_v3 = vmov 0.0   ;;  %vm156_vm0 = vmmov 0   ;;  %s227_s0 = inlined_call_operand.vmem [shape: f32[16,64], index: 0, kind: input, shape index: {}]   ;;  %s228_s1 = inlined_call_operand.vmem [shape: f32[64,32], index: 1, kind: input, shape index: {}]   ;;  %s229_s2 = inlined_call_operand.vmem [shape: f32[1,32], index: 2, kind: input, shape index: {}]   ;;  %s230_s3 = inlined_call_operand.vmem [shape: f32[16,32], index: 3, kind: input, shape index: {}]   ;;  %s231_s4 = inlined_call_operand.hbm [shape: f32[16,32], index: 4, kind: output, shape index: {}]  }
   0x1   :  { %v28_v0 = vld [vmem:[%s228_s1 + $0x30] sm:$0xff]  ;;  %v29_v1 = vld [vmem:[%s228_s1 + $0x38] sm:$0xff]  ;;  %v26_v2 = vld [vmem:[%s228_s1 + $0x20] sm:$0xff]  ;;  %116 = vmatprep.subr.bf16.mxu0 %v155_v3  ;;  %124 = vmatprep.mubr.msk.bf16.mxu0 %vm156_vm0, %v155_v3 }
   0x2   :  { %v33_v4 = vpack.c.bf16 %v29_v1, %v28_v0  ;;  %v27_v5 = vld [vmem:[%s228_s1 + $0x28] sm:$0xff] }
   0x3   :  { %v32_v6 = vpack.c.bf16 %v27_v5, %v26_v2 }
   0x4   :  { %117 = vmatpush3.bf16.msra.mxu0 %v33_v4 }
   0x5   :  { %9 = vsyncpa [#allocation3], 0  ;;  %118 = vmatprep.subr.bf16.mxu0 %v155_v3  ;;  %v24_v7 = vld [vmem:[%s228_s1 + $0x10] sm:$0xff]  ;;  %v25_v8 = vld [vmem:[%s228_s1 + $0x18] sm:$0xff]  ;;  %vm41_vm1 = vcmask 523264   ;;  %vm90_vm2 = vcmask 261120  }
   0x6   :  { %v31_v9 = vpack.c.bf16 %v25_v8, %v24_v7  ;;  %v22_v10 = vld [vmem:[%s228_s1] sm:$0xff]  ;;  %v23_v11 = vld [vmem:[%s228_s1 + $0x8] sm:$0xff]  ;;  %s157_s12 = smov [#allocation2]  }
   0x7   :  { %v30_v12 = vpack.c.bf16 %v23_v11, %v22_v10  ;;  %v19_v13 = vld [vmem:[%s227_s0] sm:$0xff]  ;;  %v20_v14 = vld [vmem:[%s227_s0 + $0x8] sm:$0xff]  ;;  %s98_s0 = sshll.u32 %s157_s12, 4  ;;  %s99_s0 = int_to_ptr.vmem [resolvable:$true] %s98_s0 }
   0x8   :  { %119 = vmatpush3.bf16.msra.mxu0 %v32_v6  ;;  %v21_v15 = vpack.c.bf16 %v20_v14, %v19_v13  ;;  %v109_v16 = vld [vmem:[%s229_s2] ss:$0 sm:$0xff]  ;;  %v87_v23 = vld [vmem:[%s230_s3 + $0x8] sm:$0xff]  ;;  %s133_s2 = scalar_lea.vmem %s99_s0, 256  ;;  %p138_p1 = scmp.lt.s32.totalorder %s99_s0, %s99_s0 }
   0x9   :  { %120 = vmatprep.subr.bf16.mxu0 %v155_v3  ;;  %v86_v18 = vld [vmem:[%s230_s3] sm:$0xff]  ;;  %p134_p0 = scmp.ne.s32.totalorder %s99_s0, %s133_s2  ;;  %p139_p2 = scmp.lt.s32.totalorder %s133_s2, %s133_s2 }
   0xb   :  { %p140_p3 = por %p139_p2, %p138_p1 }
   0xc   :  { %121 = vmatpush3.bf16.msra.mxu0 %v31_v9 }
   0xd   :  { %122 = vmatprep.subr.bf16.mxu0 %v155_v3  ;;  %p141_p4 = pnand %p140_p3, %p134_p0 }
  0x10   :  { %123 = vmatpush3.bf16.msra.mxu0 %v30_v12 }
  0x13   :  { %125 = vmatmul.mubr.msk.bf16.vlgmr.msra.gmra.mxu0 %vm41_vm1, %v21_v15 }
  0xd3   :  { %v79_v17 = vpop.f32.mrf.mxu0 }
  0xd4   :  { %v80_v19 = vadd.f32 %v109_v16, %v79_v17 }
  0xd5   :  { %v126_v20 = vpop.f32.mrf.mxu0 }
  0xd6   :  { %v88_v21 = vadd.f32 %v86_v18, %v80_v19 }
  0xd7   :  { %v82_v22 = vpop.f32.mrf.mxu0 }
  0xd8   :  { %91 = vst.msk [vmem:[#allocation2] sm:$0xff] %vm90_vm2, %v88_v21  ;;  %v83_v24 = vadd.f32 %v109_v16, %v82_v22 }
  0xd9   :  { %v127_v25 = vpop.f32.mrf.mxu0 }
  0xda   :  { %v89_v26 = vadd.f32 %v87_v23, %v83_v24 }
  0xdc   :  { %92 = vst.msk [vmem:[#allocation2 + $0x8] sm:$0xff] %vm90_vm2, %v89_v26 }
  0xdd   :  { %144 = shalt.err (!%p141_p4)
}
  0xde   :  { %s158_s15 = smov 128   ;;  %s159_s16 = smov 8  }
  0xdf   :  { %104 = dma.vmem_to_hbm [thread:$0]  %s99_s0, 256, %s231_s4, [#allocation3], %s158_s15, %s158_s15, %s159_s16  }
  0xe0   :  { %153 = dma.done.wait [#allocation3], 256  }
  0xe1   :  { %154 = vsyncadd [#allocation3], 4294967040 }
  0xe2   :  { %108 = vsyncpa [#allocation3], 1 }

</bundles_post_ra>
